<compile_context>
chip_gen: v5e
topology: v5e:2x2
jax: 0.10.0
libtpu: 0.0.40
codegen_flags: <defaults>
</compile_context>

<pallas_src>
import functools

import jax
import jax.numpy as jnp
from jax.experimental import pallas as pl
from jax.experimental.pallas import tpu as pltpu


def gcn_sep_kernel(x_ref, astk_ref, we_ref, be_ref, wf_ref, bf_ref, out_ref,
                   *, K, hidden, gn):
    # bf16 matmul operands, f32 accumulation (MXU-native on v5e/v6e/v7x).
    x = x_ref[...].astype(jnp.bfloat16)          # [GN, F]
    astk = astk_ref[...].astype(jnp.bfloat16)    # [2*GN, GN]  (blockdiag adj ; blockdiag adj^2)
    we = we_ref[...].astype(jnp.bfloat16)        # [F, H]
    wf = wf_ref[...].astype(jnp.bfloat16)        # [HF, C]

    # embed: Linear(features, hidden) + ReLU
    h = jnp.dot(x, we, preferred_element_type=jnp.float32) + be_ref[...]
    h = jnp.maximum(h, 0.0)

    # fc accumulated over the hidden reps: logits += rep_k @ wf[off:off+w].
    # Static row offsets 0, H, 3H, 7H, 15H are sublane-aligned (multiples of 16
    # even under bf16 packing), so the slices are free.
    cur = h.astype(jnp.bfloat16)                                    # [GN, H]
    logits = bf_ref[...] + jnp.dot(cur, wf[0:hidden, :],
                                   preferred_element_type=jnp.float32)

    off = hidden
    for _ in range(K):
        w = cur.shape[-1]
        # One [2*GN, GN] x [GN, w] matmul yields adj@cur and adj^2@cur at once.
        r12 = jnp.dot(astk, cur, preferred_element_type=jnp.float32)   # [2*GN, w]
        # cur_{k+1} = [adj@cur_k | adj^2@cur_k]  (rows :GN / GN: of r12).
        cur = jnp.concatenate([r12[:gn, :], r12[gn:, :]],
                              axis=-1).astype(jnp.bfloat16)             # [GN, 2w]
        logits = logits + jnp.dot(cur, wf[off:off + 2 * w, :],
                                  preferred_element_type=jnp.float32)
        off += 2 * w

    # TODO(synk): nn.Dropout(p=5e-5) treated as identity (inference/eval semantics).

    # log_softmax along the class axis (dim=1 of the PyTorch module).
    m = jnp.max(logits, axis=-1, keepdims=True)
    z = logits - m
    lse = jnp.log(jnp.sum(jnp.exp(z), axis=-1, keepdims=True))
    out_ref[...] = z - lse


def _block_diag(a):
    """[G, N, N] -> block-diagonal [G*N, G*N]."""
    G, N, _ = a.shape
    eye = jnp.eye(G, dtype=a.dtype)
    return (eye[:, None, :, None] * a[:, :, None, :]).reshape(G * N, G * N)


def gcn_with_sep(x, adj, we, be, wf, bf, *, K=4):
    """x: [N, F] or [G, N, F]; adj: [N, N] or [G, N, N]; weights pre-transposed to [in, out]."""
    single = x.ndim == 2
    if single:
        x, adj = x[None], adj[None]
    G, N, F = x.shape
    H = we.shape[1]
    HF, C = wf.shape
    assert HF == H * (2 ** (K + 1) - 1)
    GN = G * N

    # Wrapper-side prep (fused by XLA): flatten nodes, block-diagonal adjacency
    # and its elementwise square, stacked on the row axis.
    x_flat = x.reshape(GN, F)
    adj_bd = _block_diag(adj)
    adj2_bd = _block_diag(adj * adj)          # torch.pow(adj, 2) is elementwise
    astk = jnp.concatenate([adj_bd, adj2_bd], axis=0)   # [2*GN, GN]

    kernel = functools.partial(gcn_sep_kernel, K=K, hidden=H, gn=GN)

    # Advisory cost estimate so XLA schedules around the custom call sensibly.
    flops_rounds = sum(2 * (2 * GN) * GN * (H * (1 << k)) for k in range(K))
    cost = pl.CostEstimate(
        flops=2 * GN * F * H + flops_rounds + 2 * GN * HF * C,
        transcendentals=GN * C + GN,
        bytes_accessed=int((x_flat.size + astk.size + we.size + be.size
                            + wf.size + bf.size + GN * C) * 4),
    )

    out_flat = pl.pallas_call(
        kernel,
        out_shape=jax.ShapeDtypeStruct((GN, C), jnp.float32),
        in_specs=[pl.BlockSpec(memory_space=pltpu.MemorySpace.VMEM)] * 6,
        out_specs=pl.BlockSpec(memory_space=pltpu.MemorySpace.VMEM),
        cost_estimate=cost,
    )(x_flat, astk, we, be, wf, bf)

    out = out_flat.reshape(G, N, C)
    return out[0] if single else out


def reference(x, adj, we, be, wf, bf, K=4):
    adj2 = adj * adj
    h = jnp.maximum(x @ we + be, 0.0)
    reps = [h]
    cur = h
    for _ in range(K):
        cur = jnp.concatenate([adj @ cur, adj2 @ cur], axis=-1)
        reps.append(cur)
    hf = jnp.concatenate(reps, axis=-1)
    return jax.nn.log_softmax(hf @ wf + bf, axis=1)


if __name__ == "__main__":
    K = 4
    G, N, F, H, C = 4, 16, 16, 32, 8      # graphs, nodes, features, hidden, classes
    HF = H * (2 ** (K + 1) - 1)            # 32 * 31 = 992

    key = jax.random.PRNGKey(0)
    kx, kadj, kwe, kbe, kwf, kbf = jax.random.split(key, 6)

    x = jax.random.normal(kx, (G, N, F), dtype=jnp.float32)
    adj = 0.1 * jax.random.normal(kadj, (G, N, N), dtype=jnp.float32)
    # Deterministic parameter init (stand-in for nn.Linear's uniform init).
    we = 0.1 * jax.random.normal(kwe, (F, H), dtype=jnp.float32)      # embed weight^T
    be = 0.1 * jax.random.normal(kbe, (1, H), dtype=jnp.float32)      # embed bias
    wf = 0.05 * jax.random.normal(kwf, (HF, C), dtype=jnp.float32)    # fc weight^T
    bf = 0.05 * jax.random.normal(kbf, (1, C), dtype=jnp.float32)     # fc bias

    out = gcn_with_sep(x, adj, we, be, wf, bf, K=K)
    out = jax.block_until_ready(out)
    assert out.shape == (G, N, C)

    # f32 reference; tolerance relaxed for bf16 matmul operands (f32 accumulation).
    ref = jax.vmap(lambda xg, ag: reference(xg, ag, we, be, wf, bf, K=K))(x, adj)
    assert jnp.allclose(out, ref, atol=2e-2, rtol=2e-2), "batched mismatch vs. JAX reference"

    # Single-graph path (original module interface).
    out1 = jax.block_until_ready(gcn_with_sep(x[0], adj[0], we, be, wf, bf, K=K))
    assert jnp.allclose(out1, ref[0], atol=2e-2, rtol=2e-2), "single-graph mismatch"

    print("KERNEL_OK")
</pallas_src>

<mosaic_0001>
module attributes {stable_mosaic.version = 11 : i64} {
  func.func @gcn_sep_kernel(%arg0: memref<64x16xf32, #tpu.memory_space<vmem>>, %arg1: memref<128x64xf32, #tpu.memory_space<vmem>>, %arg2: memref<16x32xf32, #tpu.memory_space<vmem>>, %arg3: memref<1x32xf32, #tpu.memory_space<vmem>>, %arg4: memref<992x8xf32, #tpu.memory_space<vmem>>, %arg5: memref<1x8xf32, #tpu.memory_space<vmem>>, %arg6: memref<64x8xf32, #tpu.memory_space<vmem>>) attributes {dimension_semantics = [], scalar_prefetch = 0 : i64, scratch_operands = 0 : i64, tpu.core_type = #tpu.core_type<tc>} {
    %c0 = arith.constant 0 : index
    %c0_0 = arith.constant 0 : index
    %0 = vector.load %arg0[%c0, %c0_0] : memref<64x16xf32, #tpu.memory_space<vmem>>, vector<64x16xf32>
    %1 = arith.truncf %0 : vector<64x16xf32> to vector<64x16xbf16>
    %c0_1 = arith.constant 0 : index
    %c0_2 = arith.constant 0 : index
    %2 = vector.load %arg1[%c0_1, %c0_2] : memref<128x64xf32, #tpu.memory_space<vmem>>, vector<128x64xf32>
    %3 = arith.truncf %2 : vector<128x64xf32> to vector<128x64xbf16>
    %c0_3 = arith.constant 0 : index
    %c0_4 = arith.constant 0 : index
    %4 = vector.load %arg2[%c0_3, %c0_4] : memref<16x32xf32, #tpu.memory_space<vmem>>, vector<16x32xf32>
    %5 = arith.truncf %4 : vector<16x32xf32> to vector<16x32xbf16>
    %c0_5 = arith.constant 0 : index
    %c0_6 = arith.constant 0 : index
    %6 = vector.load %arg4[%c0_5, %c0_6] : memref<992x8xf32, #tpu.memory_space<vmem>>, vector<992x8xf32>
    %7 = arith.truncf %6 : vector<992x8xf32> to vector<992x8xbf16>
    %cst = arith.constant dense<0.000000e+00> : vector<64x32xf32>
    %8 = tpu.matmul %1, %5, %cst {dimension_numbers = #tpu.dot_dimension_numbers<[1], [0], [0], [1], [0, 0, 1, 1], [], []>} : vector<64x16xbf16>, vector<16x32xbf16>, vector<64x32xf32> -> vector<64x32xf32>
    %c0_7 = arith.constant 0 : index
    %c0_8 = arith.constant 0 : index
    %9 = vector.load %arg3[%c0_7, %c0_8] : memref<1x32xf32, #tpu.memory_space<vmem>>, vector<1x32xf32>
    %10 = vector.broadcast %9 : vector<1x32xf32> to vector<64x32xf32>
    %11 = arith.addf %8, %10 : vector<64x32xf32>
    %cst_9 = arith.constant 0.000000e+00 : f32
    %12 = vector.broadcast %cst_9 : f32 to vector<64x32xf32>
    %13 = arith.maximumf %11, %12 : vector<64x32xf32>
    %14 = arith.truncf %13 : vector<64x32xf32> to vector<64x32xbf16>
    %c0_10 = arith.constant 0 : index
    %c0_11 = arith.constant 0 : index
    %15 = vector.load %arg5[%c0_10, %c0_11] : memref<1x8xf32, #tpu.memory_space<vmem>>, vector<1x8xf32>
    %16 = vector.extract_strided_slice %7 {offsets = [0, 0], sizes = [32, 8], strides = [1, 1]} : vector<992x8xbf16> to vector<32x8xbf16>
    %cst_12 = arith.constant dense<0.000000e+00> : vector<64x8xf32>
    %17 = tpu.matmul %14, %16, %cst_12 {dimension_numbers = #tpu.dot_dimension_numbers<[1], [0], [0], [1], [0, 0, 1, 1], [], []>} : vector<64x32xbf16>, vector<32x8xbf16>, vector<64x8xf32> -> vector<64x8xf32>
    %18 = vector.broadcast %15 : vector<1x8xf32> to vector<64x8xf32>
    %19 = arith.addf %18, %17 : vector<64x8xf32>
    %cst_13 = arith.constant dense<0.000000e+00> : vector<128x32xf32>
    %20 = tpu.matmul %3, %14, %cst_13 {dimension_numbers = #tpu.dot_dimension_numbers<[1], [0], [0], [1], [0, 0, 1, 1], [], []>} : vector<128x64xbf16>, vector<64x32xbf16>, vector<128x32xf32> -> vector<128x32xf32>
    %21 = vector.extract_strided_slice %20 {offsets = [0, 0], sizes = [64, 32], strides = [1, 1]} : vector<128x32xf32> to vector<64x32xf32>
    %22 = vector.extract_strided_slice %20 {offsets = [64, 0], sizes = [64, 32], strides = [1, 1]} : vector<128x32xf32> to vector<64x32xf32>
    %23 = tpu.concatenate %21, %22 in 1 : vector<64x32xf32>, vector<64x32xf32> -> vector<64x64xf32>
    %24 = arith.truncf %23 : vector<64x64xf32> to vector<64x64xbf16>
    %25 = vector.extract_strided_slice %7 {offsets = [32, 0], sizes = [64, 8], strides = [1, 1]} : vector<992x8xbf16> to vector<64x8xbf16>
    %cst_14 = arith.constant dense<0.000000e+00> : vector<64x8xf32>
    %26 = tpu.matmul %24, %25, %cst_14 {dimension_numbers = #tpu.dot_dimension_numbers<[1], [0], [0], [1], [0, 0, 1, 1], [], []>} : vector<64x64xbf16>, vector<64x8xbf16>, vector<64x8xf32> -> vector<64x8xf32>
    %27 = arith.addf %19, %26 : vector<64x8xf32>
    %cst_15 = arith.constant dense<0.000000e+00> : vector<128x64xf32>
    %28 = tpu.matmul %3, %24, %cst_15 {dimension_numbers = #tpu.dot_dimension_numbers<[1], [0], [0], [1], [0, 0, 1, 1], [], []>} : vector<128x64xbf16>, vector<64x64xbf16>, vector<128x64xf32> -> vector<128x64xf32>
    %29 = vector.extract_strided_slice %28 {offsets = [0, 0], sizes = [64, 64], strides = [1, 1]} : vector<128x64xf32> to vector<64x64xf32>
    %30 = vector.extract_strided_slice %28 {offsets = [64, 0], sizes = [64, 64], strides = [1, 1]} : vector<128x64xf32> to vector<64x64xf32>
    %31 = tpu.concatenate %29, %30 in 1 : vector<64x64xf32>, vector<64x64xf32> -> vector<64x128xf32>
    %32 = arith.truncf %31 : vector<64x128xf32> to vector<64x128xbf16>
    %33 = vector.extract_strided_slice %7 {offsets = [96, 0], sizes = [128, 8], strides = [1, 1]} : vector<992x8xbf16> to vector<128x8xbf16>
    %cst_16 = arith.constant dense<0.000000e+00> : vector<64x8xf32>
    %34 = tpu.matmul %32, %33, %cst_16 {dimension_numbers = #tpu.dot_dimension_numbers<[1], [0], [0], [1], [0, 0, 1, 1], [], []>} : vector<64x128xbf16>, vector<128x8xbf16>, vector<64x8xf32> -> vector<64x8xf32>
    %35 = arith.addf %27, %34 : vector<64x8xf32>
    %cst_17 = arith.constant dense<0.000000e+00> : vector<128x128xf32>
    %36 = tpu.matmul %3, %32, %cst_17 {dimension_numbers = #tpu.dot_dimension_numbers<[1], [0], [0], [1], [0, 0, 1, 1], [], []>} : vector<128x64xbf16>, vector<64x128xbf16>, vector<128x128xf32> -> vector<128x128xf32>
    %37 = vector.extract_strided_slice %36 {offsets = [0, 0], sizes = [64, 128], strides = [1, 1]} : vector<128x128xf32> to vector<64x128xf32>
    %38 = vector.extract_strided_slice %36 {offsets = [64, 0], sizes = [64, 128], strides = [1, 1]} : vector<128x128xf32> to vector<64x128xf32>
    %39 = tpu.concatenate %37, %38 in 1 : vector<64x128xf32>, vector<64x128xf32> -> vector<64x256xf32>
    %40 = arith.truncf %39 : vector<64x256xf32> to vector<64x256xbf16>
    %41 = vector.extract_strided_slice %7 {offsets = [224, 0], sizes = [256, 8], strides = [1, 1]} : vector<992x8xbf16> to vector<256x8xbf16>
    %cst_18 = arith.constant dense<0.000000e+00> : vector<64x8xf32>
    %42 = tpu.matmul %40, %41, %cst_18 {dimension_numbers = #tpu.dot_dimension_numbers<[1], [0], [0], [1], [0, 0, 1, 1], [], []>} : vector<64x256xbf16>, vector<256x8xbf16>, vector<64x8xf32> -> vector<64x8xf32>
    %43 = arith.addf %35, %42 : vector<64x8xf32>
    %cst_19 = arith.constant dense<0.000000e+00> : vector<128x256xf32>
    %44 = tpu.matmul %3, %40, %cst_19 {dimension_numbers = #tpu.dot_dimension_numbers<[1], [0], [0], [1], [0, 0, 1, 1], [], []>} : vector<128x64xbf16>, vector<64x256xbf16>, vector<128x256xf32> -> vector<128x256xf32>
    %45 = vector.extract_strided_slice %44 {offsets = [0, 0], sizes = [64, 256], strides = [1, 1]} : vector<128x256xf32> to vector<64x256xf32>
    %46 = vector.extract_strided_slice %44 {offsets = [64, 0], sizes = [64, 256], strides = [1, 1]} : vector<128x256xf32> to vector<64x256xf32>
    %47 = tpu.concatenate %45, %46 in 1 : vector<64x256xf32>, vector<64x256xf32> -> vector<64x512xf32>
    %48 = arith.truncf %47 : vector<64x512xf32> to vector<64x512xbf16>
    %49 = vector.extract_strided_slice %7 {offsets = [480, 0], sizes = [512, 8], strides = [1, 1]} : vector<992x8xbf16> to vector<512x8xbf16>
    %cst_20 = arith.constant dense<0.000000e+00> : vector<64x8xf32>
    %50 = tpu.matmul %48, %49, %cst_20 {dimension_numbers = #tpu.dot_dimension_numbers<[1], [0], [0], [1], [0, 0, 1, 1], [], []>} : vector<64x512xbf16>, vector<512x8xbf16>, vector<64x8xf32> -> vector<64x8xf32>
    %51 = arith.addf %43, %50 : vector<64x8xf32>
    %cst_21 = arith.constant dense<0xFF800000> : vector<64xf32>
    %52 = vector.multi_reduction <maximumf>, %51, %cst_21 [1] : vector<64x8xf32> to vector<64xf32>
    %53 = vector.shape_cast %52 : vector<64xf32> to vector<64x1xf32>
    %54 = vector.broadcast %53 : vector<64x1xf32> to vector<64x8xf32>
    %55 = arith.subf %51, %54 : vector<64x8xf32>
    %56 = math.exp %55 : vector<64x8xf32>
    %cst_22 = arith.constant dense<0.000000e+00> : vector<64xf32>
    %57 = vector.multi_reduction <add>, %56, %cst_22 [1] : vector<64x8xf32> to vector<64xf32>
    %58 = vector.shape_cast %57 : vector<64xf32> to vector<64x1xf32>
    %59 = math.log %58 : vector<64x1xf32>
    %60 = vector.broadcast %59 : vector<64x1xf32> to vector<64x8xf32>
    %61 = arith.subf %55, %60 : vector<64x8xf32>
    %c0_23 = arith.constant 0 : index
    %c0_24 = arith.constant 0 : index
    %62 = vector.load %arg6[%c0_23, %c0_24] : memref<64x8xf32, #tpu.memory_space<vmem>>, vector<64x8xf32>
    tpu.vector_store %arg6[%c0_23, %c0_24], %61 {strides = array<i32>} : memref<64x8xf32, #tpu.memory_space<vmem>>, vector<64x8xf32>,
    return
  }
}

</mosaic_0001>

<bundles_post_ra>
// kernel: tpu_custom_call.1
= control target key start
LH: loop header
LB: loop body
LE: loop exit
PB: predicated region body
PF: predicated region fallthrough
CT: control target
= control target key end

     0   :  { %vm315_vm0 = vcmask 130048   ;;  %vm382_vm1 = vcmask 261120   ;;  %vm435_vm2 = vcmask 523264   ;;  %s1692_s22 = smov 64   ;;  %vm1453_vm3 = vcmask 64512   ;;  %s2539_s2 = inlined_call_operand.vmem [shape: f32[16,32], index: 2, kind: input, shape index: {}]   ;;  %s2540_s0 = inlined_call_operand.vmem [shape: f32[64,16], index: 0, kind: input, shape index: {}]   ;;  %s2541_s3 = inlined_call_operand.vmem [shape: f32[1,32], index: 3, kind: input, shape index: {}]   ;;  %s2542_s4 = inlined_call_operand.vmem [shape: f32[992,8], index: 4, kind: input, shape index: {}]   ;;  %s2543_s5 = inlined_call_operand.vmem [shape: f32[1,8], index: 5, kind: input, shape index: {}]   ;;  %s2544_s1 = inlined_call_operand.vmem [shape: f32[128,64], index: 1, kind: input, shape index: {}]   ;;  %s2545_s6 = inlined_call_operand.vmem [shape: f32[64,8], index: 6, kind: output, shape index: {}]  }
   0x1   :  { %v60_v0 = vld [vmem:[%s2539_s2] sm:$0xff]  ;;  %v61_v1 = vld [vmem:[%s2539_s2 + $0x8] sm:$0xff]  ;;  %v26_v6 = vld [vmem:[%s2540_s0 + $0x10] sm:$0xff] }
   0x2   :  { %v24_v2 = vld [vmem:[%s2540_s0] sm:$0xff]  ;;  %v62_v3 = vpack.c.bf16 %v61_v1, %v60_v0  ;;  %v25_v4 = vld [vmem:[%s2540_s0 + $0x8] sm:$0xff]  ;;  %v27_v7 = vld [vmem:[%s2540_s0 + $0x18] sm:$0xff] }
   0x3   :  { %v32_v5 = vpack.c.bf16 %v25_v4, %v24_v2  ;;  %v33_v8 = vpack.c.bf16 %v27_v7, %v26_v6  ;;  %v28_v9 = vld [vmem:[%s2540_s0 + $0x20] sm:$0xff]  ;;  %v29_v10 = vld [vmem:[%s2540_s0 + $0x28] sm:$0xff]  ;;  %v30_v12 = vld [vmem:[%s2540_s0 + $0x30] sm:$0xff] }
   0x4   :  { %335 = vmatpush.bf16.msra.mxu0 %v62_v3  ;;  %v34_v11 = vpack.c.bf16 %v29_v10, %v28_v9  ;;  %v31_v13 = vld [vmem:[%s2540_s0 + $0x38] sm:$0xff]  ;;  %v65_v15 = vld [vmem:[%s2542_s4 + $0x10] sm:$0xff]  ;;  %v63_v21 = vld [vmem:[%s2542_s4] sm:$0xff] }
   0x5   :  { %v35_v14 = vpack.c.bf16 %v31_v13, %v30_v12  ;;  %v66_v16 = vld [vmem:[%s2542_s4 + $0x18] sm:$0xff]  ;;  %v189_v17 = vpack.c.bf16 %v65_v15, %v65_v15  ;;  %v64_v22 = vld [vmem:[%s2542_s4 + $0x8] sm:$0xff]  ;;  %v187_v24 = vpack.c.bf16 %v63_v21, %v63_v21  ;;  %v1656_v30 = vld [vmem:[%s2541_s3] ss:$0 sm:$0xff] }
   0x6   :  { %v190_v18 = vpack.c.bf16 %v66_v16, %v66_v16  ;;  %v188_v25 = vpack.c.bf16 %v64_v22, %v64_v22  ;;  %v36_v58 = vld [vmem:[%s2544_s1] sm:$0xff]  ;;  %v37_v59 = vld [vmem:[%s2544_s1 + $0x8] sm:$0xff]  ;;  %v38_v61 = vld [vmem:[%s2544_s1 + $0x10] sm:$0xff] }
   0x7   :  { %1562 = vmatmul.msk.bf16.vlgmr.msra.gmra.mxu0 %vm315_vm0, %v32_v5  ;;  %v376_v19 = vunpack.c.l.b16 %v189_v17  ;;  %v374_v26 = vunpack.c.l.b16 %v187_v24  ;;  %v1783_v60 = vpack.c.bf16 %v37_v59, %v36_v58  ;;  %v39_v62 = vld [vmem:[%s2544_s1 + $0x18] sm:$0xff]  ;;  %v40_v0 = vld [vmem:[%s2544_s1 + $0x20] sm:$0xff]  ;;  %v41_v1 = vld [vmem:[%s2544_s1 + $0x28] sm:$0xff] }
   0x8   :  { %v377_v20 = vunpack.c.l.b16 %v190_v18  ;;  %v375_v27 = vunpack.c.l.b16 %v188_v25  ;;  %v1793_v63 = vpack.c.bf16 %v39_v62, %v38_v61  ;;  %v1803_v2 = vpack.c.bf16 %v41_v1, %v40_v0  ;;  %v42_v3 = vld [vmem:[%s2544_s1 + $0x30] sm:$0xff]  ;;  %v43_v4 = vld [vmem:[%s2544_s1 + $0x38] sm:$0xff]  ;;  %v44_v6 = vld [vmem:[%s2544_s1 + $0x40] sm:$0xff] }
   0x9   :  { %v1813_v5 = vpack.c.bf16 %v43_v4, %v42_v3  ;;  %v45_v7 = vld [vmem:[%s2544_s1 + $0x48] sm:$0xff]  ;;  %v46_v9 = vld [vmem:[%s2544_s1 + $0x50] sm:$0xff]  ;;  %v47_v10 = vld [vmem:[%s2544_s1 + $0x58] sm:$0xff] }
   0xa   :  { %v379_v23 = vpack.c.b16 %v377_v20, %v376_v19  ;;  %v378_v28 = vpack.c.b16 %v375_v27, %v374_v26  ;;  %v48_v12 = vld [vmem:[%s2544_s1 + $0x60] sm:$0xff]  ;;  %v49_v13 = vld [vmem:[%s2544_s1 + $0x68] sm:$0xff]  ;;  %v50_v15 = vld [vmem:[%s2544_s1 + $0x70] sm:$0xff] }
   0xb   :  { %v51_v16 = vld [vmem:[%s2544_s1 + $0x78] sm:$0xff]  ;;  %s1691_s1 = smov 32   ;;  %v67_v58 = vld [vmem:[%s2542_s4 + $0x20] sm:$0xff]  ;;  %v68_v59 = vld [vmem:[%s2542_s4 + $0x28] sm:$0xff] }
   0xc   :  { %401 = vmatpush.bf16.msra.mxu1 %v379_v23  ;;  %v1853_v17 = vpack.c.bf16 %v51_v16, %v50_v15  ;;  %v191_v62 = vpack.c.bf16 %v67_v58, %v67_v58  ;;  %v192_v0 = vpack.c.bf16 %v68_v59, %v68_v59 }
   0xe   :  { %v561_v1 = vunpack.c.l.b16 %v191_v62  ;;  %v562_v3 = vunpack.c.l.b16 %v192_v0 }
  0x10   :  { %402 = vmatpush.bf16.msra.mxu1 %v378_v28  ;;  %v569_v4 = vpack.c.b16 %v562_v3, %v561_v1 }
  0x17   :  { %1563 = vmatmul.msk.bf16.gmra.mxu0 %vm315_vm0, %v33_v8  ;;  %v1823_v8 = vpack.c.bf16 %v45_v7, %v44_v6 }
  0x27   :  { %1564 = vmatmul.msk.bf16.gmra.mxu0 %vm315_vm0, %v34_v11  ;;  %v1833_v11 = vpack.c.bf16 %v47_v10, %v46_v9 }
  0x37   :  { %1565 = vmatmul.msk.bf16.gmra.mxu0 %vm315_vm0, %v35_v14  ;;  %v1843_v14 = vpack.c.bf16 %v49_v13, %v48_v12 }
  0x84   :  { %v337_v29 = vpop.f32.mrf.mxu0 }
  0x85   :  { %v338_v31 = vadd.f32 %v1656_v30, %v337_v29 }
  0x87   :  { %v357_v34 = vmax.f32 %v338_v31, 0.0 }
  0x8c   :  { %v339_v32 = vpop.f32.mrf.mxu0 }
  0x8d   :  { %v340_v33 = vadd.f32 %v1656_v30, %v339_v32 }
  0x8f   :  { %v358_v35 = vmax.f32 %v340_v33, 0.0  ;;  %v73_v33 = vld [vmem:[%s2542_s4 + $0x50] sm:$0xff] }
  0x91   :  { %v365_v36 = vpack.c.bf16 %v358_v35, %v357_v34  ;;  %v74_v34 = vld [vmem:[%s2542_s4 + $0x58] sm:$0xff]  ;;  %v197_v35 = vpack.c.bf16 %v73_v33, %v73_v33 }
  0x93   :  { %1566 = vmatmul.msk.bf16.vlgmr.msra.gmra.mxu1 %vm382_vm1, %v365_v36 }
  0x94   :  { %v342_v37 = vpop.f32.mrf.mxu0 }
  0x95   :  { %v343_v38 = vadd.f32 %v1656_v30, %v342_v37  ;;  %v567_v37 = vunpack.c.l.b16 %v197_v35 }
  0x97   :  { %v359_v41 = vmax.f32 %v343_v38, 0.0 }
  0x9c   :  { %v344_v39 = vpop.f32.mrf.mxu0 }
  0x9d   :  { %v345_v40 = vadd.f32 %v1656_v30, %v344_v39 }
  0x9f   :  { %v360_v42 = vmax.f32 %v345_v40, 0.0 }
  0xa1   :  { %v366_v43 = vpack.c.bf16 %v360_v42, %v359_v41 }
  0xa3   :  { %1567 = vmatmul.msk.bf16.gmra.mxu1 %vm382_vm1, %v366_v43 }
  0xa4   :  { %v347_v44 = vpop.f32.mrf.mxu0 }
  0xa5   :  { %v348_v45 = vadd.f32 %v1656_v30, %v347_v44 }
  0xa7   :  { %v361_v48 = vmax.f32 %v348_v45, 0.0  ;;  %v71_v45 = vld [vmem:[%s2542_s4 + $0x40] sm:$0xff] }
  0xac   :  { %v349_v46 = vpop.f32.mrf.mxu0 }
  0xad   :  { %v350_v47 = vadd.f32 %v1656_v30, %v349_v46  ;;  %v72_v46 = vld [vmem:[%s2542_s4 + $0x48] sm:$0xff] }
  0xaf   :  { %v362_v49 = vmax.f32 %v350_v47, 0.0  ;;  %v195_v47 = vpack.c.bf16 %v71_v45, %v71_v45 }
  0xb1   :  { %v367_v50 = vpack.c.bf16 %v362_v49, %v361_v48  ;;  %v196_v48 = vpack.c.bf16 %v72_v46, %v72_v46  ;;  %v565_v49 = vunpack.c.l.b16 %v195_v47 }
  0xb3   :  { %1568 = vmatmul.msk.bf16.gmra.mxu1 %vm382_vm1, %v367_v50 }
  0xb4   :  { %v352_v51 = vpop.f32.mrf.mxu0 }
  0xb5   :  { %v353_v52 = vadd.f32 %v1656_v30, %v352_v51  ;;  %v69_v51 = vld [vmem:[%s2542_s4 + $0x30] sm:$0xff] }
  0xb7   :  { %v363_v55 = vmax.f32 %v353_v52, 0.0  ;;  %v70_v52 = vld [vmem:[%s2542_s4 + $0x38] sm:$0xff] }
  0xbc   :  { %v354_v53 = vpop.f32.mrf.mxu0 }
  0xbd   :  { %v355_v54 = vadd.f32 %v1656_v30, %v354_v53 }
  0xbf   :  { %v364_v56 = vmax.f32 %v355_v54, 0.0  ;;  %v193_v54 = vpack.c.bf16 %v69_v51, %v69_v51 }
  0xc1   :  { %v368_v57 = vpack.c.bf16 %v364_v56, %v363_v55  ;;  %v194_v55 = vpack.c.bf16 %v70_v52, %v70_v52  ;;  %v563_v56 = vunpack.c.l.b16 %v193_v54 }
  0xc3   :  { %1569 = vmatmul.msk.bf16.gmra.mxu1 %vm382_vm1, %v368_v57  ;;  %464 = vmatpush.bf16.msra.mxu2 %v368_v57  ;;  %v564_v57 = vunpack.c.l.b16 %v194_v55 }
  0xc5   :  { %v570_v61 = vpack.c.b16 %v564_v57, %v563_v56 }
  0xc7   :  { %465 = vmatpush.bf16.msra.mxu2 %v367_v50  ;;  %v566_v50 = vunpack.c.l.b16 %v196_v48 }
  0xc9   :  { %v571_v53 = vpack.c.b16 %v566_v50, %v565_v49 }
  0xcb   :  { %466 = vmatpush.bf16.msra.mxu2 %v366_v43 }
  0xcf   :  { %467 = vmatpush.bf16.msra.mxu2 %v365_v36  ;;  %v198_v36 = vpack.c.bf16 %v74_v34, %v74_v34 }
  0xd1   :  { %v568_v38 = vunpack.c.l.b16 %v198_v36 }
  0xd2   :  { %1570 = vmatmul.msk.bf16.vlgmr.msra.gmra.mxu2 %vm435_vm2, %v1783_v60 }
  0xd3   :  { %v572_v40 = vpack.c.b16 %v568_v38, %v567_v37 }
  0xd5   :  { %593 = vmatpush.bf16.msra.mxu3 %v572_v40 }
  0xd9   :  { %594 = vmatpush.bf16.msra.mxu3 %v571_v53 }
  0xdd   :  { %595 = vmatpush.bf16.msra.mxu3 %v570_v61 }
  0xe1   :  { %596 = vmatpush.bf16.msra.mxu3 %v569_v4 }
  0xe2   :  { %1571 = vmatmul.msk.bf16.gmra.mxu2 %vm435_vm2, %v1793_v63 }
  0xf2   :  { %1572 = vmatmul.msk.bf16.gmra.mxu2 %vm435_vm2, %v1803_v2 }
 0x102   :  { %1573 = vmatmul.msk.bf16.gmra.mxu2 %vm435_vm2, %v1813_v5 }
 0x112   :  { %1574 = vmatmul.msk.bf16.gmra.mxu2 %vm435_vm2, %v1823_v8 }
 0x122   :  { %1575 = vmatmul.msk.bf16.gmra.mxu2 %vm435_vm2, %v1833_v11 }
 0x132   :  { %1576 = vmatmul.msk.bf16.gmra.mxu2 %vm435_vm2, %v1843_v14 }
 0x142   :  { %1577 = vmatmul.msk.bf16.gmra.mxu2 %vm435_vm2, %v1853_v17 }
 0x155   :  { %v469_v18 = vpop.f32.mrf.mxu2 }
 0x15d   :  { %v471_v19 = vpop.f32.mrf.mxu2 }
 0x165   :  { %v1857_v20 = vpop.f32.mrf.mxu2 }
 0x16d   :  { %v1859_v21 = vpop.f32.mrf.mxu2 }
 0x175   :  { %v1861_v22 = vpop.f32.mrf.mxu2 }
 0x17d   :  { %v1863_v23 = vpop.f32.mrf.mxu2 }
 0x185   :  { %v1865_v24 = vpop.f32.mrf.mxu2 }
 0x18d   :  { %v1867_v25 = vpop.f32.mrf.mxu2 }
 0x195   :  { %v489_v26 = vpop.f32.mrf.mxu2 }
 0x19d   :  { %v491_v27 = vpop.f32.mrf.mxu2 }
 0x19e   :  { %v1631_v32 = vpack.i.bf16 %v491_v27, %v489_v26 }
 0x1a5   :  { %v494_v28 = vpop.f32.mrf.mxu2 }
 0x1ad   :  { %v496_v29 = vpop.f32.mrf.mxu2 }
 0x1ae   :  { %v1626_v30 = vpack.i.bf16 %v496_v29, %v494_v28 }
 0x1b0   :  { %1627 = vrot.lane.b32.xlu1 %v1626_v30, %s1691_s1 }
 0x1b5   :  { %v499_v31 = vpop.f32.mrf.mxu2 }
 0x1b8   :  { %1632 = vrot.lane.b32.xlu1 %v1631_v32, %s1691_s1 }
 0x1bd   :  { %v501_v39 = vpop.f32.mrf.mxu2 }
 0x1be   :  { %v1621_v44 = vpack.i.bf16 %v501_v39, %v499_v31 }
 0x1c5   :  { %v504_v41 = vpop.f32.mrf.mxu2 }
 0x1cd   :  { %v506_v42 = vpop.f32.mrf.mxu2 }
 0x1ce   :  { %v1616_v43 = vpack.i.bf16 %v506_v42, %v504_v41 }
 0x1d0   :  { %1617 = vrot.lane.b32.xlu0 %v1616_v43, %s1691_s1 }
 0x1d8   :  { %1622 = vrot.lane.b32.xlu0 %v1621_v44, %s1691_s1 }
 0x222   :  { %v1628_v6 = vpop.permute.xlu1 %1627 }
 0x223   :  { %v1630_v16 = vunpack.i.h.bf16 %v1628_v6  ;;  %v1629_v26 = vunpack.i.l.bf16 %v1628_v6 }
 0x225   :  { %v543_v27 = vsel %vm382_vm1, %v1857_v20, %v1629_v26  ;;  %v544_v28 = vsel %vm382_vm1, %v1859_v21, %v1630_v16  ;;  %v90_v16 = vld [vmem:[%s2542_s4 + $0xd8] sm:$0xff]  ;;  %v87_v26 = vld [vmem:[%s2542_s4 + $0xc0] sm:$0xff] }
 0x226   :  { %v550_v29 = vpack.c.bf16 %v544_v28, %v543_v27  ;;  %v214_v28 = vpack.c.bf16 %v90_v16, %v90_v16 }
 0x22a   :  { %v1633_v7 = vpop.permute.xlu1 %1632 }
 0x22b   :  { %v1635_v9 = vunpack.i.h.bf16 %v1633_v7  ;;  %v1634_v10 = vunpack.i.l.bf16 %v1633_v7 }
 0x22d   :  { %v541_v12 = vsel %vm382_vm1, %v469_v18, %v1634_v10  ;;  %v542_v13 = vsel %vm382_vm1, %v471_v19, %v1635_v9 }
 0x22e   :  { %v549_v15 = vpack.c.bf16 %v542_v13, %v541_v12 }
 0x230   :  { %1578 = vmatmul.msk.bf16.vlgmr.msra.gmra.mxu3 %vm435_vm2, %v549_v15 }
 0x240   :  { %1579 = vmatmul.msk.bf16.gmra.mxu3 %vm435_vm2, %v550_v29 }
 0x242   :  { %v1618_v30 = vpop.permute.xlu0 %1617 }
 0x243   :  { %v1620_v31 = vunpack.i.h.bf16 %v1618_v30  ;;  %v1619_v32 = vunpack.i.l.bf16 %v1618_v30  ;;  %v211_v30 = vpack.c.bf16 %v87_v26, %v87_v26 }
 0x245   :  { %v547_v18 = vsel %vm382_vm1, %v1865_v24, %v1619_v32  ;;  %v548_v19 = vsel %vm382_vm1, %v1867_v25, %v1620_v31  ;;  %v1657_v24 = vld [vmem:[%s2543_s5] ss:$0 sm:$0xff]  ;;  %v85_v31 = vld [vmem:[%s2542_s4 + $0xb0] sm:$0xff]  ;;  %v86_v32 = vld [vmem:[%s2542_s4 + $0xb8] sm:$0xff] }
 0x246   :  { %v552_v33 = vpack.c.bf16 %v548_v19, %v547_v18  ;;  %v209_v19 = vpack.c.bf16 %v85_v31, %v85_v31 }
 0x248   :  { %630 = vmatpush.bf16.msrb.mxu0 %v552_v33 }
 0x24a   :  { %v1623_v34 = vpop.permute.xlu0 %1622 }
 0x24b   :  { %v1625_v35 = vunpack.i.h.bf16 %v1623_v34  ;;  %v1624_v20 = vunpack.i.l.bf16 %v1623_v34  ;;  %v750_v34 = vunpack.c.l.b16 %v214_v28  ;;  %v78_v28 = vld [vmem:[%s2542_s4 + $0x78] sm:$0xff] }
 0x24d   :  { %v545_v21 = vsel %vm382_vm1, %v1861_v22, %v1624_v20  ;;  %v546_v36 = vsel %vm382_vm1, %v1863_v23, %v1625_v35  ;;  %v404_v22 = vpop.f32.mrf.mxu1  ;;  %v747_v35 = vunpack.c.l.b16 %v211_v30  ;;  %v210_v20 = vpack.c.bf16 %v86_v32, %v86_v32 }
 0x24e   :  { %v551_v37 = vpack.c.bf16 %v546_v36, %v545_v21  ;;  %v427_v25 = vadd.f32 %v1657_v24, %v404_v22  ;;  %v83_v21 = vld [vmem:[%s2542_s4 + $0xa0] sm:$0xff] }
 0x250   :  { %1580 = vmatmul.msk.bf16.gmra.mxu3 %vm435_vm2, %v551_v37  ;;  %631 = vmatpush.bf16.msrb.mxu0 %v551_v37  ;;  %v84_v37 = vld [vmem:[%s2542_s4 + $0xa8] sm:$0xff] }
 0x254   :  { %632 = vmatpush.bf16.msrb.mxu0 %v550_v29  ;;  %v88_v29 = vld [vmem:[%s2542_s4 + $0xc8] sm:$0xff] }
 0x255   :  { %v1923_v23 = vpop.f32.mrf.mxu1  ;;  %v212_v18 = vpack.c.bf16 %v88_v29, %v88_v29 }
 0x257   :  { %v748_v36 = vunpack.c.l.b16 %v212_v18  ;;  %v202_v18 = vpack.c.bf16 %v78_v28, %v78_v28 }
 0x258   :  { %633 = vmatpush.bf16.msrb.mxu0 %v549_v15  ;;  %v89_v15 = vld [vmem:[%s2542_s4 + $0xd0] sm:$0xff] }
 0x259   :  { %v213_v27 = vpack.c.bf16 %v89_v15, %v89_v15 }
 0x25b   :  { %1582 = vmatmul.msk.bf16.vlgmr.msrb.gmra.mxu0 %vm435_vm2, %v1783_v60 }
 0x25d   :  { %v409_v40 = vpop.f32.mrf.mxu1 }
 0x25e   :  { %v429_v43 = vadd.f32 %v1657_v24, %v409_v40  ;;  %v745_v40 = vunpack.c.l.b16 %v209_v19 }
 0x260   :  { %1581 = vmatmul.msk.bf16.gmra.mxu3 %vm435_vm2, %v552_v33  ;;  %v749_v33 = vunpack.c.l.b16 %v213_v27  ;;  %v77_v27 = vld [vmem:[%s2542_s4 + $0x70] sm:$0xff] }
 0x261   :  { %v201_v29 = vpack.c.bf16 %v77_v27, %v77_v27 }
 0x265   :  { %v1934_v42 = vpop.f32.mrf.mxu1 }
 0x26b   :  { %1583 = vmatmul.msk.bf16.gmra.mxu0 %vm435_vm2, %v1793_v63 }
 0x26d   :  { %v414_v46 = vpop.f32.mrf.mxu1 }
 0x26e   :  { %v431_v48 = vadd.f32 %v1657_v24, %v414_v46  ;;  %v81_v46 = vld [vmem:[%s2542_s4 + $0x90] sm:$0xff] }
 0x275   :  { %v1944_v51 = vpop.f32.mrf.mxu1 }
 0x27b   :  { %1584 = vmatmul.msk.bf16.gmra.mxu0 %vm435_vm2, %v1803_v2 }
 0x27d   :  { %v419_v54 = vpop.f32.mrf.mxu1 }
 0x27e   :  { %v433_v56 = vadd.f32 %v1657_v24, %v419_v54  ;;  %v758_v24 = vpack.c.b16 %v750_v34, %v749_v33 }
 0x280   :  { %767 = vmatpush.bf16.msrb.mxu1 %v758_v24  ;;  %v76_v24 = vld [vmem:[%s2542_s4 + $0x68] sm:$0xff] }
 0x28b   :  { %1585 = vmatmul.msk.bf16.gmra.mxu0 %vm435_vm2, %v1813_v5 }
 0x29b   :  { %1586 = vmatmul.msk.bf16.gmra.mxu0 %vm435_vm2, %v1823_v8 }
 0x2ab   :  { %1587 = vmatmul.msk.bf16.gmra.mxu0 %vm435_vm2, %v1833_v11 }
 0x2b3   :  { %v598_v38 = vpop.f32.mrf.mxu3 }
 0x2b4   :  { %v1928_v39 = vadd.f32 %v598_v38, %v427_v25  ;;  %v207_v25 = vpack.c.bf16 %v83_v21, %v83_v21  ;;  %v757_v38 = vpack.c.b16 %v748_v36, %v747_v35  ;;  %v737_v35 = vunpack.c.l.b16 %v201_v29 }
 0x2b6   :  { %768 = vmatpush.bf16.msrb.mxu1 %v757_v38  ;;  %v200_v38 = vpack.c.bf16 %v76_v24, %v76_v24 }
 0x2bb   :  { %v1930_v41 = vpop.f32.mrf.mxu3  ;;  %1588 = vmatmul.msk.bf16.gmra.mxu0 %vm435_vm2, %v1843_v14 }
 0x2c3   :  { %v603_v44 = vpop.f32.mrf.mxu3 }
 0x2c4   :  { %v1936_v45 = vadd.f32 %v603_v44, %v429_v43  ;;  %v746_v43 = vunpack.c.l.b16 %v210_v20  ;;  %v208_v44 = vpack.c.bf16 %v84_v37, %v84_v37  ;;  %v738_v20 = vunpack.c.l.b16 %v202_v18  ;;  %v75_v37 = vld [vmem:[%s2542_s4 + $0x60] sm:$0xff] }
 0x2c5   :  { %v103_v18 = vld [vmem:[%s2542_s4 + $0x140] sm:$0xff] }
 0x2c6   :  { %v756_v54 = vpack.c.b16 %v746_v43, %v745_v40  ;;  %v752_v21 = vpack.c.b16 %v738_v20, %v737_v35  ;;  %v736_v43 = vunpack.c.l.b16 %v200_v38 }
 0x2c8   :  { %769 = vmatpush.bf16.msrb.mxu1 %v756_v54 }
 0x2cb   :  { %v1938_v47 = vpop.f32.mrf.mxu3  ;;  %1589 = vmatmul.msk.bf16.gmra.mxu0 %vm435_vm2, %v1853_v17 }
 0x2d3   :  { %v608_v49 = vpop.f32.mrf.mxu3 }
 0x2d4   :  { %v1942_v50 = vadd.f32 %v608_v49, %v431_v48  ;;  %v82_v48 = vld [vmem:[%s2542_s4 + $0x98] sm:$0xff]  ;;  %v205_v49 = vpack.c.bf16 %v81_v46, %v81_v46 }
 0x2d8   :  { %v1946_v52 = vpop.f32.mrf.mxu0 }
 0x2db   :  { %v1948_v53 = vpop.f32.mrf.mxu3 }
 0x2e0   :  { %v1950_v55 = vpop.f32.mrf.mxu0 }
 0x2e3   :  { %v613_v57 = vpop.f32.mrf.mxu3 }
 0x2e4   :  { %v1952_v58 = vadd.f32 %v613_v57, %v433_v56  ;;  %v743_v56 = vunpack.c.l.b16 %v207_v25  ;;  %v744_v57 = vunpack.c.l.b16 %v208_v44  ;;  %v199_v25 = vpack.c.bf16 %v75_v37, %v75_v37  ;;  %v102_v37 = vld [vmem:[%s2542_s4 + $0x138] sm:$0xff] }
 0x2e5   :  { %v226_v38 = vpack.c.bf16 %v102_v37, %v102_v37 }
 0x2e6   :  { %v735_v40 = vunpack.c.l.b16 %v199_v25 }
 0x2e8   :  { %v1954_v59 = vpop.f32.mrf.mxu0  ;;  %v751_v44 = vpack.c.b16 %v736_v43, %v735_v40 }
 0x2f0   :  { %v1956_v61 = vpop.f32.mrf.mxu0 }
 0x2f8   :  { %v1958_v62 = vpop.f32.mrf.mxu0 }
 0x300   :  { %v1960_v0 = vpop.f32.mrf.mxu0 }
 0x308   :  { %v1962_v1 = vpop.f32.mrf.mxu0 }
 0x310   :  { %v1964_v3 = vpop.f32.mrf.mxu0 }
 0x318   :  { %v655_v4 = vpop.f32.mrf.mxu0 }
 0x320   :  { %v657_v6 = vpop.f32.mrf.mxu0 }
 0x321   :  { %v1651_v7 = vpack.i.bf16 %v657_v6, %v655_v4  ;;  %v206_v4 = vpack.c.bf16 %v82_v48, %v82_v48  ;;  %v79_v6 = vld [vmem:[%s2542_s4 + $0x80] sm:$0xff] }
 0x322   :  { %v203_v16 = vpack.c.bf16 %v79_v6, %v79_v6 }
 0x323   :  { %1652 = vrot.lane.b32.xlu1 %v1651_v7, %s1692_s22  ;;  %v80_v7 = vld [vmem:[%s2542_s4 + $0x88] sm:$0xff]  ;;  %v742_v15 = vunpack.c.l.b16 %v206_v4 }
 0x324   :  { %v204_v26 = vpack.c.bf16 %v80_v7, %v80_v7  ;;  %v739_v31 = vunpack.c.l.b16 %v203_v16 }
 0x326   :  { %v740_v32 = vunpack.c.l.b16 %v204_v26 }
 0x328   :  { %v660_v9 = vpop.f32.mrf.mxu0  ;;  %v753_v34 = vpack.c.b16 %v740_v32, %v739_v31 }
 0x330   :  { %v662_v10 = vpop.f32.mrf.mxu0 }
 0x331   :  { %v1646_v12 = vpack.i.bf16 %v662_v10, %v660_v9  ;;  %v741_v10 = vunpack.c.l.b16 %v205_v49 }
 0x333   :  { %1647 = vrot.lane.b32.xlu0 %v1646_v12, %s1692_s22  ;;  %v755_v12 = vpack.c.b16 %v744_v57, %v743_v56  ;;  %v754_v30 = vpack.c.b16 %v742_v15, %v741_v10 }
 0x335   :  { %770 = vmatpush.bf16.msrb.mxu1 %v755_v12 }
 0x338   :  { %v1968_v13 = vpop.f32.mrf.mxu0 }
 0x339   :  { %771 = vmatpush.bf16.msrb.mxu1 %v754_v30  ;;  %v2053_v30 = vpop.f32.mrf.mxu1 }
 0x33d   :  { %772 = vmatpush.bf16.msrb.mxu1 %v753_v34  ;;  %v227_v34 = vpack.c.bf16 %v103_v18, %v103_v18 }
 0x33f   :  { %v905_v20 = vunpack.c.l.b16 %v227_v34 }
 0x340   :  { %v667_v22 = vpop.f32.mrf.mxu0 }
 0x341   :  { %v1641_v36 = vpack.i.bf16 %v667_v22, %v1968_v13  ;;  %773 = vmatpush.bf16.msrb.mxu1 %v752_v21 }
 0x345   :  { %774 = vmatpush.bf16.msrb.mxu1 %v751_v44 }
 0x348   :  { %v670_v9 = vpop.f32.mrf.mxu0 }
 0x350   :  { %v672_v19 = vpop.f32.mrf.mxu0 }
 0x351   :  { %v1636_v33 = vpack.i.bf16 %v672_v19, %v670_v9  ;;  %v104_v19 = vld [vmem:[%s2542_s4 + $0x148] sm:$0xff] }
 0x352   :  { %v228_v35 = vpack.c.bf16 %v104_v19, %v104_v19  ;;  %v91_v19 = vld [vmem:[%s2542_s4 + $0xe0] sm:$0xff] }
 0x353   :  { %1637 = vrot.lane.b32.xlu2 %v1636_v33, %s1692_s22 }
 0x354   :  { %v906_v21 = vunpack.c.l.b16 %v228_v35  ;;  %v215_v35 = vpack.c.bf16 %v91_v19, %v91_v19  ;;  %v113_v19 = vld [vmem:[%s2542_s4 + $0x190] sm:$0xff] }
 0x356   :  { %v931_v24 = vpack.c.b16 %v906_v21, %v905_v20  ;;  %v893_v21 = vunpack.c.l.b16 %v215_v35  ;;  %v237_v35 = vpack.c.bf16 %v113_v19, %v113_v19 }
 0x35b   :  { %1642 = vrot.lane.b32.xlu2 %v1641_v36, %s1692_s22  ;;  %v101_v36 = vld [vmem:[%s2542_s4 + $0x130] sm:$0xff] }
 0x35c   :  { %v225_v25 = vpack.c.bf16 %v101_v36, %v101_v36 }
 0x35e   :  { %v903_v44 = vunpack.c.l.b16 %v225_v25 }
 0x395   :  { %v1653_v46 = vpop.permute.xlu1 %1652 }
 0x396   :  { %v1655_v48 = vunpack.i.h.bf16 %v1653_v46  ;;  %v1654_v13 = vunpack.i.l.bf16 %v1653_v46  ;;  %v904_v46 = vunpack.c.l.b16 %v226_v38 }
 0x398   :  { %v707_v22 = vsel %vm435_vm2, %v1946_v52, %v1654_v13  ;;  %v708_v49 = vsel %vm435_vm2, %v1950_v55, %v1655_v48  ;;  %v99_v48 = vld [vmem:[%s2542_s4 + $0x120] sm:$0xff]  ;;  %v100_v13 = vld [vmem:[%s2542_s4 + $0x128] sm:$0xff] }
 0x399   :  { %v715_v54 = vpack.c.bf16 %v708_v49, %v707_v22  ;;  %v930_v22 = vpack.c.b16 %v904_v46, %v903_v44  ;;  %v223_v49 = vpack.c.bf16 %v99_v48, %v99_v48 }
 0x39b   :  { %775 = vmatmul.bf16.vlgmr.msrb.gmra.mxu1 %v715_v54 }
 0x3a5   :  { %v1648_v56 = vpop.permute.xlu0 %1647 }
 0x3a6   :  { %v1650_v57 = vunpack.i.h.bf16 %v1648_v56  ;;  %v1649_v4 = vunpack.i.l.bf16 %v1648_v56  ;;  %v901_v56 = vunpack.c.l.b16 %v223_v49 }
 0x3a8   :  { %v709_v6 = vsel %vm435_vm2, %v1954_v59, %v1649_v4  ;;  %v710_v7 = vsel %vm435_vm2, %v1956_v61, %v1650_v57  ;;  %v98_v4 = vld [vmem:[%s2542_s4 + $0x118] sm:$0xff] }
 0x3a9   :  { %v716_v9 = vpack.c.bf16 %v710_v7, %v709_v6 }
 0x3ab   :  { %780 = vmatmul.bf16.gmra.mxu1 %v716_v9 }
 0x3ad   :  { %v1638_v10 = vpop.permute.xlu2 %1637 }
 0x3ae   :  { %v1640_v12 = vunpack.i.h.bf16 %v1638_v10  ;;  %v1639_v15 = vunpack.i.l.bf16 %v1638_v10 }
 0x3b0   :  { %v713_v52 = vsel %vm435_vm2, %v1962_v1, %v1639_v15  ;;  %v714_v55 = vsel %vm435_vm2, %v1964_v3, %v1640_v12 }
 0x3b1   :  { %v718_v16 = vpack.c.bf16 %v714_v55, %v713_v52  ;;  %v95_v52 = vld [vmem:[%s2542_s4 + $0x100] sm:$0xff]  ;;  %v96_v55 = vld [vmem:[%s2542_s4 + $0x108] sm:$0xff] }
 0x3b3   :  { %808 = vmatpush.bf16.msrb.mxu3 %v718_v16 }
 0x3b5   :  { %v1643_v26 = vpop.permute.xlu2 %1642 }
 0x3b6   :  { %v1645_v27 = vunpack.i.h.bf16 %v1643_v26  ;;  %v1644_v28 = vunpack.i.l.bf16 %v1643_v26  ;;  %v219_v26 = vpack.c.bf16 %v95_v52, %v95_v52  ;;  %v117_v52 = vld [vmem:[%s2542_s4 + $0x1b0] sm:$0xff] }
 0x3b8   :  { %v711_v59 = vsel %vm435_vm2, %v1958_v62, %v1644_v28  ;;  %v712_v61 = vsel %vm435_vm2, %v1960_v0, %v1645_v27  ;;  %v105_v62 = vld [vmem:[%s2542_s4 + $0x150] sm:$0xff]  ;;  %v106_v0 = vld [vmem:[%s2542_s4 + $0x158] sm:$0xff]  ;;  %v220_v27 = vpack.c.bf16 %v96_v55, %v96_v55  ;;  %v897_v28 = vunpack.c.l.b16 %v219_v26 }
 0x3b9   :  { %v717_v29 = vpack.c.bf16 %v712_v61, %v711_v59  ;;  %v229_v1 = vpack.c.bf16 %v105_v62, %v105_v62  ;;  %v230_v3 = vpack.c.bf16 %v106_v0, %v106_v0  ;;  %v93_v61 = vld [vmem:[%s2542_s4 + $0xf0] sm:$0xff]  ;;  %v118_v55 = vld [vmem:[%s2542_s4 + $0x1b8] sm:$0xff]  ;;  %v241_v26 = vpack.c.bf16 %v117_v52, %v117_v52  ;;  %v108_v52 = vld [vmem:[%s2542_s4 + $0x168] sm:$0xff] }
 0x3ba   :  { %v898_v59 = vunpack.c.l.b16 %v220_v27  ;;  %v217_v0 = vpack.c.bf16 %v93_v61, %v93_v61  ;;  %v242_v27 = vpack.c.bf16 %v118_v55, %v118_v55 }
 0x3bb   :  { %785 = vmatmul.bf16.gmra.mxu1 %v717_v29  ;;  %809 = vmatpush.bf16.msrb.mxu3 %v717_v29  ;;  %v907_v31 = vunpack.c.l.b16 %v229_v1  ;;  %v908_v32 = vunpack.c.l.b16 %v230_v3  ;;  %v94_v29 = vld [vmem:[%s2542_s4 + $0xf8] sm:$0xff] }
 0x3bc   :  { %v927_v62 = vpack.c.b16 %v898_v59, %v897_v28  ;;  %v218_v1 = vpack.c.bf16 %v94_v29, %v94_v29  ;;  %v919_v59 = vunpack.c.l.b16 %v241_v26  ;;  %v920_v61 = vunpack.c.l.b16 %v242_v27  ;;  %v115_v29 = vld [vmem:[%s2542_s4 + $0x1a0] sm:$0xff] }
 0x3bd   :  { %v932_v33 = vpack.c.b16 %v908_v32, %v907_v31  ;;  %v895_v32 = vunpack.c.l.b16 %v217_v0  ;;  %v232_v26 = vpack.c.bf16 %v108_v52, %v108_v52 }
 0x3be   :  { %v896_v18 = vunpack.c.l.b16 %v218_v1  ;;  %v938_v0 = vpack.c.b16 %v920_v61, %v919_v59  ;;  %v239_v1 = vpack.c.bf16 %v115_v29, %v115_v29 }
 0x3bf   :  { %810 = vmatpush.bf16.msrb.mxu3 %v716_v9  ;;  %957 = vmatpush.bf16.msra.mxu1 %v932_v33  ;;  %v222_v9 = vpack.c.bf16 %v98_v4, %v98_v4  ;;  %v92_v33 = vld [vmem:[%s2542_s4 + $0xe8] sm:$0xff] }
 0x3c0   :  { %v926_v34 = vpack.c.b16 %v896_v18, %v895_v32  ;;  %v216_v20 = vpack.c.bf16 %v92_v33, %v92_v33  ;;  %v120_v4 = vld [vmem:[%s2542_s4 + $0x1c8] sm:$0xff]  ;;  %v917_v32 = vunpack.c.l.b16 %v239_v1  ;;  %v114_v33 = vld [vmem:[%s2542_s4 + $0x198] sm:$0xff] }
 0x3c1   :  { %v900_v15 = vunpack.c.l.b16 %v222_v9  ;;  %v244_v9 = vpack.c.bf16 %v120_v4, %v120_v4 }
 0x3c2   :  { %v894_v36 = vunpack.c.l.b16 %v216_v20  ;;  %v238_v20 = vpack.c.bf16 %v114_v33, %v114_v33 }
 0x3c3   :  { %811 = vmatpush.bf16.msrb.mxu3 %v715_v54  ;;  %958 = vmatpush.bf16.msra.mxu1 %v931_v24  ;;  %v224_v54 = vpack.c.bf16 %v100_v13, %v100_v13  ;;  %v121_v13 = vld [vmem:[%s2542_s4 + $0x1d0] sm:$0xff] }
 0x3c4   :  { %v925_v37 = vpack.c.b16 %v894_v36, %v893_v21  ;;  %v245_v49 = vpack.c.bf16 %v121_v13, %v121_v13  ;;  %v915_v36 = vunpack.c.l.b16 %v237_v35 }
 0x3c5   :  { %v902_v57 = vunpack.c.l.b16 %v224_v54 }
 0x3c6   :  { %1590 = vmatmul.msk.bf16.vlgmr.msrb.gmra.mxu3 %vm435_vm2, %v1783_v60 }
 0x3c7   :  { %959 = vmatpush.bf16.msra.mxu1 %v930_v22  ;;  %v929_v6 = vpack.c.b16 %v902_v57, %v901_v56  ;;  %v122_v22 = vld [vmem:[%s2542_s4 + $0x1d8] sm:$0xff]  ;;  %v923_v56 = vunpack.c.l.b16 %v245_v49 }
 0x3cb   :  { %790 = vmatmul.bf16.gmra.mxu1 %v718_v16 }
 0x3cc   :  { %960 = vmatpush.bf16.msra.mxu1 %v929_v6 }
 0x3d6   :  { %1591 = vmatmul.msk.bf16.gmra.mxu3 %vm435_vm2, %v1793_v63 }
 0x3e6   :  { %1592 = vmatmul.msk.bf16.gmra.mxu3 %vm435_vm2, %v1803_v2 }
 0x3f6   :  { %1593 = vmatmul.msk.bf16.gmra.mxu3 %vm435_vm2, %v1813_v5 }
 0x406   :  { %1594 = vmatmul.msk.bf16.gmra.mxu3 %vm435_vm2, %v1823_v8 }
 0x416   :  { %1595 = vmatmul.msk.bf16.gmra.mxu3 %vm435_vm2, %v1833_v11 }
 0x418   :  { %v776_v40 = vpop.f32.mrf.mxu1 }
 0x419   :  { %v2070_v43 = vadd.f32 %v776_v40, %v1928_v39  ;;  %v97_v39 = vld [vmem:[%s2542_s4 + $0x110] sm:$0xff]  ;;  %v2118_v40 = vpop.f32.mrf.mxu3 }
 0x41a   :  { %v221_v7 = vpack.c.bf16 %v97_v39, %v97_v39 }
 0x41c   :  { %v899_v12 = vunpack.c.l.b16 %v221_v7 }
 0x41e   :  { %v928_v16 = vpack.c.b16 %v900_v15, %v899_v12  ;;  %v922_v15 = vunpack.c.l.b16 %v244_v9 }
 0x420   :  { %v2084_v10 = vpop.f32.mrf.mxu1  ;;  %961 = vmatpush.bf16.msra.mxu1 %v928_v16 }
 0x424   :  { %962 = vmatpush.bf16.msra.mxu1 %v927_v62  ;;  %v116_v62 = vld [vmem:[%s2542_s4 + $0x1a8] sm:$0xff] }
 0x426   :  { %1596 = vmatmul.msk.bf16.gmra.mxu3 %vm435_vm2, %v1843_v14 }
 0x428   :  { %v781_v3 = vpop.f32.mrf.mxu1  ;;  %963 = vmatpush.bf16.msra.mxu1 %v926_v34 }
 0x429   :  { %v2101_v31 = vadd.f32 %v781_v3, %v1936_v45  ;;  %v240_v3 = vpack.c.bf16 %v116_v62, %v116_v62 }
 0x42b   :  { %v918_v18 = vunpack.c.l.b16 %v240_v3 }
 0x42c   :  { %964 = vmatpush.bf16.msra.mxu1 %v925_v37  ;;  %v916_v37 = vunpack.c.l.b16 %v238_v20 }
 0x42d   :  { %v937_v34 = vpack.c.b16 %v918_v18, %v917_v32 }
 0x42e   :  { %v936_v13 = vpack.c.b16 %v916_v37, %v915_v36 }
 0x430   :  { %v2109_v45 = vpop.f32.mrf.mxu1 }
 0x436   :  { %1597 = vmatmul.msk.bf16.gmra.mxu3 %vm435_vm2, %v1853_v17 }
 0x438   :  { %v786_v24 = vpop.f32.mrf.mxu1 }
 0x439   :  { %v2114_v25 = vadd.f32 %v786_v24, %v1942_v50  ;;  %v246_v50 = vpack.c.bf16 %v122_v22, %v122_v22 }
 0x43b   :  { %v924_v57 = vunpack.c.l.b16 %v246_v50 }
 0x43d   :  { %v940_v6 = vpack.c.b16 %v924_v57, %v923_v56  ;;  %v109_v56 = vld [vmem:[%s2542_s4 + $0x170] sm:$0xff]  ;;  %v110_v57 = vld [vmem:[%s2542_s4 + $0x178] sm:$0xff] }
 0x43e   :  { %v233_v4 = vpack.c.bf16 %v109_v56, %v109_v56 }
 0x43f   :  { %986 = vmatpush.bf16.msrb.mxu2 %v940_v6  ;;  %v234_v6 = vpack.c.bf16 %v110_v57, %v110_v57 }
 0x440   :  { %v2116_v38 = vpop.f32.mrf.mxu1  ;;  %v911_v9 = vunpack.c.l.b16 %v233_v4 }
 0x448   :  { %v791_v44 = vpop.f32.mrf.mxu1 }
 0x449   :  { %v2121_v46 = vadd.f32 %v791_v44, %v1952_v58  ;;  %v813_v48 = vpop.f32.mrf.mxu3  ;;  %v119_v58 = vld [vmem:[%s2542_s4 + $0x1c0] sm:$0xff] }
 0x44a   :  { %v243_v7 = vpack.c.bf16 %v119_v58, %v119_v58  ;;  %v111_v44 = vld [vmem:[%s2542_s4 + $0x180] sm:$0xff] }
 0x44b   :  { %v235_v22 = vpack.c.bf16 %v111_v44, %v111_v44  ;;  %v138_v44 = vld [vmem:[%s2542_s4 + $0x258] sm:$0xff] }
 0x44c   :  { %v921_v12 = vunpack.c.l.b16 %v243_v7 }
 0x44d   :  { %v913_v50 = vunpack.c.l.b16 %v235_v22 }
 0x44e   :  { %v939_v16 = vpack.c.b16 %v922_v15, %v921_v12  ;;  %v912_v12 = vunpack.c.l.b16 %v234_v6  ;;  %v107_v15 = vld [vmem:[%s2542_s4 + $0x160] sm:$0xff]  ;;  %v133_v6 = vld [vmem:[%s2542_s4 + $0x230] sm:$0xff] }
 0x450   :  { %987 = vmatpush.bf16.msrb.mxu2 %v939_v16  ;;  %v934_v55 = vpack.c.b16 %v912_v12, %v911_v9  ;;  %v231_v16 = vpack.c.bf16 %v107_v15, %v107_v15  ;;  %v257_v12 = vpack.c.bf16 %v133_v6, %v133_v6  ;;  %v124_v6 = vld [vmem:[%s2542_s4 + $0x1e8] sm:$0xff] }
 0x451   :  { %v815_v54 = vpop.f32.mrf.mxu3 }
 0x452   :  { %v2129_v39 = vpack.c.bf16 %v815_v54, %v813_v48  ;;  %v112_v48 = vld [vmem:[%s2542_s4 + $0x188] sm:$0xff]  ;;  %v909_v27 = vunpack.c.l.b16 %v231_v16  ;;  %v1211_v52 = vunpack.c.l.b16 %v257_v12  ;;  %v131_v16 = vld [vmem:[%s2542_s4 + $0x220] sm:$0xff]  ;;  %v248_v12 = vpack.c.bf16 %v124_v6, %v124_v6 }
 0x453   :  { %v236_v49 = vpack.c.bf16 %v112_v48, %v112_v48 }
 0x454   :  { %965 = vmatmul.bf16.vlgmr.msra.gmra.mxu1 %v2129_v39  ;;  %988 = vmatpush.bf16.msrb.mxu2 %v938_v0 }
 0x455   :  { %v914_v54 = vunpack.c.l.b16 %v236_v49 }
 0x457   :  { %v935_v58 = vpack.c.b16 %v914_v54, %v913_v50  ;;  %v135_v50 = vld [vmem:[%s2542_s4 + $0x240] sm:$0xff] }
 0x458   :  { %989 = vmatpush.bf16.msrb.mxu2 %v937_v34  ;;  %v259_v56 = vpack.c.bf16 %v135_v50, %v135_v50  ;;  %v126_v50 = vld [vmem:[%s2542_s4 + $0x1f8] sm:$0xff] }
 0x459   :  { %v818_v28 = vpop.f32.mrf.mxu3 }
 0x45c   :  { %990 = vmatpush.bf16.msrb.mxu2 %v936_v13  ;;  %v262_v13 = vpack.c.bf16 %v138_v44, %v138_v44 }
 0x45e   :  { %v1216_v49 = vunpack.c.l.b16 %v262_v13 }
 0x460   :  { %991 = vmatpush.bf16.msrb.mxu2 %v935_v58  ;;  %v1213_v58 = vunpack.c.l.b16 %v259_v56 }
 0x461   :  { %v820_v21 = vpop.f32.mrf.mxu3 }
 0x462   :  { %v855_v24 = vpack.c.bf16 %v820_v21, %v818_v28  ;;  %v910_v28 = vunpack.c.l.b16 %v232_v26  ;;  %v132_v26 = vld [vmem:[%s2542_s4 + $0x228] sm:$0xff] }
 0x464   :  { %970 = vmatmul.bf16.gmra.mxu1 %v855_v24  ;;  %992 = vmatpush.bf16.msrb.mxu2 %v934_v55  ;;  %v933_v59 = vpack.c.b16 %v910_v28, %v909_v27  ;;  %v255_v28 = vpack.c.bf16 %v131_v16, %v131_v16  ;;  %v151_v16 = vld [vmem:[%s2542_s4 + $0x2c0] sm:$0xff] }
 0x468   :  { %993 = vmatpush.bf16.msrb.mxu2 %v933_v59  ;;  %v256_v59 = vpack.c.bf16 %v132_v26, %v132_v26  ;;  %v152_v26 = vld [vmem:[%s2542_s4 + $0x2c8] sm:$0xff] }
 0x469   :  { %v823_v7 = vpop.f32.mrf.mxu3 }
 0x471   :  { %v825_v61 = vpop.f32.mrf.mxu3 }
 0x472   :  { %v857_v29 = vpack.c.bf16 %v825_v61, %v823_v7  ;;  %v134_v7 = vld [vmem:[%s2542_s4 + $0x238] sm:$0xff]  ;;  %v1209_v61 = vunpack.c.l.b16 %v255_v28  ;;  %v276_v28 = vpack.c.bf16 %v152_v26, %v152_v26 }
 0x473   :  { %v258_v15 = vpack.c.bf16 %v134_v7, %v134_v7 }
 0x474   :  { %975 = vmatmul.bf16.gmra.mxu1 %v857_v29 }
 0x475   :  { %v1212_v55 = vunpack.c.l.b16 %v258_v15 }
 0x477   :  { %v1270_v27 = vpack.c.b16 %v1212_v55, %v1211_v52  ;;  %v1202_v52 = vunpack.c.l.b16 %v248_v12 }
 0x479   :  { %v828_v62 = vpop.f32.mrf.mxu3 }
 0x481   :  { %v830_v0 = vpop.f32.mrf.mxu3 }
 0x482   :  { %v859_v1 = vpack.c.bf16 %v830_v0, %v828_v62  ;;  %v130_v62 = vld [vmem:[%s2542_s4 + $0x218] sm:$0xff] }
 0x484   :  { %980 = vmatmul.bf16.gmra.mxu1 %v859_v1  ;;  %1027 = vmatpush.bf16.msra.mxu0 %v859_v1 }
 0x488   :  { %1028 = vmatpush.bf16.msra.mxu0 %v857_v29  ;;  %v1210_v29 = vunpack.c.l.b16 %v256_v59 }
 0x489   :  { %v833_v3 = vpop.f32.mrf.mxu3 }
 0x48a   :  { %v1269_v0 = vpack.c.b16 %v1210_v29, %v1209_v61  ;;  %v1230_v61 = vunpack.c.l.b16 %v276_v28 }
 0x48c   :  { %1029 = vmatpush.bf16.msra.mxu0 %v855_v24  ;;  %v137_v24 = vld [vmem:[%s2542_s4 + $0x250] sm:$0xff] }
 0x48d   :  { %v261_v48 = vpack.c.bf16 %v137_v24, %v137_v24 }
 0x48f   :  { %v1215_v22 = vunpack.c.l.b16 %v261_v48 }
 0x490   :  { %1030 = vmatpush.bf16.msra.mxu0 %v2129_v39 }
 0x491   :  { %v835_v32 = vpop.f32.mrf.mxu3  ;;  %v1272_v54 = vpack.c.b16 %v1216_v49, %v1215_v22  ;;  %v125_v49 = vld [vmem:[%s2542_s4 + $0x1f0] sm:$0xff] }
 0x492   :  { %v854_v18 = vpack.c.bf16 %v835_v32, %v833_v3  ;;  %v254_v3 = vpack.c.bf16 %v130_v62, %v130_v62  ;;  %v153_v32 = vld [vmem:[%s2542_s4 + $0x2d0] sm:$0xff] }
 0x493   :  { %1598 = vmatmul.msk.bf16.vlgmr.msra.gmra.mxu0 %vm435_vm2, %v1783_v60  ;;  %1329 = vmatpush.bf16.msra.mxu2 %v1272_v54  ;;  %v250_v54 = vpack.c.bf16 %v126_v50, %v126_v50  ;;  %v149_v62 = vld [vmem:[%s2542_s4 + $0x2b0] sm:$0xff] }
 0x494   :  { %994 = vmatmul.bf16.vlgmr.msrb.gmra.mxu2 %v854_v18 }
 0x499   :  { %v838_v19 = vpop.f32.mrf.mxu3 }
 0x4a1   :  { %v840_v33 = vpop.f32.mrf.mxu3 }
 0x4a2   :  { %v856_v34 = vpack.c.bf16 %v840_v33, %v838_v19  ;;  %v277_v19 = vpack.c.bf16 %v153_v32, %v153_v32 }
 0x4a3   :  { %1599 = vmatmul.msk.bf16.gmra.mxu0 %vm435_vm2, %v1793_v63 }
 0x4a4   :  { %999 = vmatmul.bf16.gmra.mxu2 %v856_v34 }
 0x4a9   :  { %v843_v35 = vpop.f32.mrf.mxu3 }
 0x4b1   :  { %v845_v20 = vpop.f32.mrf.mxu3 }
 0x4b2   :  { %v858_v21 = vpack.c.bf16 %v845_v20, %v843_v35  ;;  %v1208_v35 = vunpack.c.l.b16 %v254_v3  ;;  %v127_v20 = vld [vmem:[%s2542_s4 + $0x200] sm:$0xff] }
 0x4b3   :  { %1600 = vmatmul.msk.bf16.gmra.mxu0 %vm435_vm2, %v1803_v2  ;;  %v251_v24 = vpack.c.bf16 %v127_v20, %v127_v20  ;;  %v169_v20 = vld [vmem:[%s2542_s4 + $0x350] sm:$0xff] }
 0x4b4   :  { %1004 = vmatmul.bf16.gmra.mxu2 %v858_v21 }
 0x4b5   :  { %v1205_v13 = vunpack.c.l.b16 %v251_v24 }
 0x4b9   :  { %v848_v39 = vpop.f32.mrf.mxu3 }
 0x4c1   :  { %v850_v36 = vpop.f32.mrf.mxu3 }
 0x4c2   :  { %v860_v37 = vpack.c.bf16 %v850_v36, %v848_v39  ;;  %v1231_v39 = vunpack.c.l.b16 %v277_v19 }
 0x4c3   :  { %1601 = vmatmul.msk.bf16.gmra.mxu0 %vm435_vm2, %v1813_v5 }
 0x4c4   :  { %1009 = vmatmul.bf16.gmra.mxu2 %v860_v37  ;;  %1076 = vmatpush.bf16.msrb.mxu1 %v860_v37 }
 0x4c8   :  { %1077 = vmatpush.bf16.msrb.mxu1 %v858_v21  ;;  %v128_v21 = vld [vmem:[%s2542_s4 + $0x208] sm:$0xff] }
 0x4c9   :  { %v252_v44 = vpack.c.bf16 %v128_v21, %v128_v21  ;;  %v170_v21 = vld [vmem:[%s2542_s4 + $0x358] sm:$0xff] }
 0x4ca   :  { %v294_v24 = vpack.c.bf16 %v170_v21, %v170_v21  ;;  %v161_v21 = vld [vmem:[%s2542_s4 + $0x310] sm:$0xff] }
 0x4cb   :  { %v1206_v22 = vunpack.c.l.b16 %v252_v44 }
 0x4cc   :  { %1078 = vmatpush.bf16.msrb.mxu1 %v856_v34 }
 0x4cd   :  { %v1267_v56 = vpack.c.b16 %v1206_v22, %v1205_v13  ;;  %v148_v13 = vld [vmem:[%s2542_s4 + $0x2a8] sm:$0xff] }
 0x4d0   :  { %1079 = vmatpush.bf16.msrb.mxu1 %v854_v18  ;;  %v154_v18 = vld [vmem:[%s2542_s4 + $0x2d8] sm:$0xff] }
 0x4d1   :  { %v278_v33 = vpack.c.bf16 %v154_v18, %v154_v18 }
 0x4d3   :  { %1606 = vmatmul.msk.bf16.vlgmr.msrb.gmra.mxu1 %vm435_vm2, %v1783_v60  ;;  %1602 = vmatmul.msk.bf16.gmra.mxu0 %vm435_vm2, %v1823_v8  ;;  %v136_v60 = vld [vmem:[%s2542_s4 + $0x248] sm:$0xff]  ;;  %v1232_v36 = vunpack.c.l.b16 %v278_v33 }
 0x4d4   :  { %v260_v57 = vpack.c.bf16 %v136_v60, %v136_v60  ;;  %v249_v60 = vpack.c.bf16 %v125_v49, %v125_v49  ;;  %v1248_v49 = vunpack.c.l.b16 %v294_v24 }
 0x4d5   :  { %v1280_v48 = vpack.c.b16 %v1232_v36, %v1231_v39 }
 0x4d6   :  { %v1214_v4 = vunpack.c.l.b16 %v260_v57  ;;  %v1203_v57 = vunpack.c.l.b16 %v249_v60  ;;  %v272_v60 = vpack.c.bf16 %v148_v13, %v148_v13 }
 0x4d7   :  { %1358 = vmatpush.bf16.msra.mxu3 %v1280_v48 }
 0x4d8   :  { %v1271_v9 = vpack.c.b16 %v1214_v4, %v1213_v58  ;;  %v1204_v58 = vunpack.c.l.b16 %v250_v54  ;;  %v123_v4 = vld [vmem:[%s2542_s4 + $0x1e0] sm:$0xff]  ;;  %v1226_v6 = vunpack.c.l.b16 %v272_v60 }
 0x4d9   :  { %v167_v54 = vld [vmem:[%s2542_s4 + $0x340] sm:$0xff] }
 0x4da   :  { %1330 = vmatpush.bf16.msra.mxu2 %v1271_v9  ;;  %v1266_v7 = vpack.c.b16 %v1204_v58, %v1203_v57  ;;  %v247_v9 = vpack.c.bf16 %v123_v4, %v123_v4  ;;  %v291_v57 = vpack.c.bf16 %v167_v54, %v167_v54 }
 0x4dc   :  { %v1201_v15 = vunpack.c.l.b16 %v247_v9 }
 0x4de   :  { %1331 = vmatpush.bf16.msra.mxu2 %v1270_v27  ;;  %v1265_v55 = vpack.c.b16 %v1202_v52, %v1201_v15  ;;  %v275_v27 = vpack.c.bf16 %v151_v16, %v151_v16  ;;  %v165_v52 = vld [vmem:[%s2542_s4 + $0x330] sm:$0xff] }
 0x4e0   :  { %v1229_v59 = vunpack.c.l.b16 %v275_v27 }
 0x4e2   :  { %1332 = vmatpush.bf16.msra.mxu2 %v1269_v0  ;;  %v1279_v29 = vpack.c.b16 %v1230_v61, %v1229_v59  ;;  %v150_v0 = vld [vmem:[%s2542_s4 + $0x2b8] sm:$0xff]  ;;  %v289_v59 = vpack.c.bf16 %v165_v52, %v165_v52  ;;  %v141_v52 = vld [vmem:[%s2542_s4 + $0x270] sm:$0xff] }
 0x4e3   :  { %1607 = vmatmul.msk.bf16.gmra.mxu1 %vm435_vm2, %v1793_v63  ;;  %1603 = vmatmul.msk.bf16.gmra.mxu0 %vm435_vm2, %v1833_v11  ;;  %v129_v63 = vld [vmem:[%s2542_s4 + $0x210] sm:$0xff]  ;;  %v274_v3 = vpack.c.bf16 %v150_v0, %v150_v0  ;;  %v164_v0 = vld [vmem:[%s2542_s4 + $0x328] sm:$0xff] }
 0x4e4   :  { %v253_v1 = vpack.c.bf16 %v129_v63, %v129_v63  ;;  %1359 = vmatpush.bf16.msra.mxu3 %v1279_v29  ;;  %v1243_v29 = vunpack.c.l.b16 %v289_v59  ;;  %v265_v59 = vpack.c.bf16 %v141_v52, %v141_v52 }
 0x4e5   :  { %v1228_v19 = vunpack.c.l.b16 %v274_v3 }
 0x4e6   :  { %v1207_v34 = vunpack.c.l.b16 %v253_v1  ;;  %v273_v1 = vpack.c.bf16 %v149_v62, %v149_v62  ;;  %v163_v62 = vld [vmem:[%s2542_s4 + $0x320] sm:$0xff] }
 0x4e7   :  { %v287_v3 = vpack.c.bf16 %v163_v62, %v163_v62 }
 0x4e8   :  { %v1268_v37 = vpack.c.b16 %v1208_v35, %v1207_v34  ;;  %v1227_v18 = vunpack.c.l.b16 %v273_v1 }
 0x4ea   :  { %1333 = vmatpush.bf16.msra.mxu2 %v1268_v37  ;;  %v1278_v33 = vpack.c.b16 %v1228_v19, %v1227_v18  ;;  %v293_v37 = vpack.c.bf16 %v169_v20, %v169_v20  ;;  %v145_v18 = vld [vmem:[%s2542_s4 + $0x290] sm:$0xff]  ;;  %v146_v19 = vld [vmem:[%s2542_s4 + $0x298] sm:$0xff] }
 0x4ec   :  { %1360 = vmatpush.bf16.msra.mxu3 %v1278_v33  ;;  %v1247_v22 = vunpack.c.l.b16 %v293_v37  ;;  %v270_v33 = vpack.c.bf16 %v146_v19, %v146_v19 }
 0x4ee   :  { %1334 = vmatpush.bf16.msra.mxu2 %v1267_v56  ;;  %v1288_v56 = vpack.c.b16 %v1248_v49, %v1247_v22  ;;  %v143_v22 = vld [vmem:[%s2542_s4 + $0x280] sm:$0xff]  ;;  %v144_v49 = vld [vmem:[%s2542_s4 + $0x288] sm:$0xff] }
 0x4f2   :  { %1335 = vmatpush.bf16.msra.mxu2 %v1266_v7  ;;  %v1245_v7 = vunpack.c.l.b16 %v291_v57  ;;  %v268_v57 = vpack.c.bf16 %v144_v49, %v144_v49 }
 0x4f3   :  { %1608 = vmatmul.msk.bf16.gmra.mxu1 %vm435_vm2, %v1803_v2  ;;  %1604 = vmatmul.msk.bf16.gmra.mxu0 %vm435_vm2, %v1843_v14  ;;  %v2249_v2 = vpop.f32.mrf.mxu1 }
 0x4f6   :  { %1336 = vmatpush.bf16.msra.mxu2 %v1265_v55  ;;  %v166_v55 = vld [vmem:[%s2542_s4 + $0x338] sm:$0xff] }
 0x4f7   :  { %v290_v61 = vpack.c.bf16 %v166_v55, %v166_v55  ;;  %v142_v55 = vld [vmem:[%s2542_s4 + $0x278] sm:$0xff] }
 0x4fa   :  { %1387 = vmatpush.bf16.msrb.mxu2 %v1288_v56  ;;  %v267_v56 = vpack.c.bf16 %v143_v22, %v143_v22 }
 0x4fb   :  { %v966_v63 = vpop.f32.mrf.mxu1 }
 0x503   :  { %1609 = vmatmul.msk.bf16.gmra.mxu1 %vm435_vm2, %v1813_v5  ;;  %1605 = vmatmul.msk.bf16.gmra.mxu0 %vm435_vm2, %v1853_v17  ;;  %v968_v32 = vpop.f32.mrf.mxu1 }
 0x50b   :  { %v971_v5 = vpop.f32.mrf.mxu1 }
 0x510   :  { %v1032_v34 = vpop.f32.mrf.mxu0 }
 0x513   :  { %1610 = vmatmul.msk.bf16.gmra.mxu1 %vm435_vm2, %v1823_v8  ;;  %v147_v8 = vld [vmem:[%s2542_s4 + $0x2a0] sm:$0xff]  ;;  %v2296_v16 = vpop.f32.mrf.mxu1 }
 0x514   :  { %v271_v50 = vpack.c.bf16 %v147_v8, %v147_v8 }
 0x516   :  { %v1225_v4 = vunpack.c.l.b16 %v271_v50  ;;  %v285_v50 = vpack.c.bf16 %v161_v21, %v161_v21 }
 0x517   :  { %v995_v35 = vpop.f32.mrf.mxu2 }
 0x518   :  { %v996_v39 = vadd.f32 %v995_v35, %v966_v63  ;;  %v1034_v36 = vpop.f32.mrf.mxu0  ;;  %v1277_v15 = vpack.c.b16 %v1226_v6, %v1225_v4  ;;  %v1244_v63 = vunpack.c.l.b16 %v290_v61  ;;  %v159_v6 = vld [vmem:[%s2542_s4 + $0x300] sm:$0xff]  ;;  %v266_v61 = vpack.c.bf16 %v142_v55, %v142_v55 }
 0x519   :  { %v1121_v44 = vpack.c.bf16 %v1034_v36, %v1032_v34  ;;  %v1241_v34 = vunpack.c.l.b16 %v287_v3 }
 0x51a   :  { %v2276_v48 = vadd.f32 %v996_v39, %v2070_v43  ;;  %v168_v43 = vld [vmem:[%s2542_s4 + $0x348] sm:$0xff]  ;;  %1361 = vmatpush.bf16.msra.mxu3 %v1277_v15  ;;  %v1286_v1 = vpack.c.b16 %v1244_v63, %v1243_v29  ;;  %v162_v39 = vld [vmem:[%s2542_s4 + $0x318] sm:$0xff]  ;;  %v1220_v19 = vunpack.c.l.b16 %v266_v61 }
 0x51b   :  { %1337 = vmatmul.bf16.vlgmr.msra.gmra.mxu2 %v1121_v44  ;;  %v292_v58 = vpack.c.bf16 %v168_v43, %v168_v43  ;;  %v1224_v44 = vunpack.c.l.b16 %v270_v33  ;;  %v286_v60 = vpack.c.bf16 %v162_v39, %v162_v39  ;;  %v976_v54 = vpop.f32.mrf.mxu1  ;;  %v139_v33 = vld [vmem:[%s2542_s4 + $0x260] sm:$0xff] }
 0x51c   :  { %v263_v39 = vpack.c.bf16 %v139_v33, %v139_v33  ;;  %v183_v33 = vld [vmem:[%s2542_s4 + $0x3c0] sm:$0xff] }
 0x51d   :  { %v1246_v9 = vunpack.c.l.b16 %v292_v58  ;;  %v1239_v58 = vunpack.c.l.b16 %v285_v50  ;;  %v1240_v4 = vunpack.c.l.b16 %v286_v60 }
 0x51f   :  { %v997_v12 = vpop.f32.mrf.mxu2  ;;  %v1287_v28 = vpack.c.b16 %v1246_v9, %v1245_v7  ;;  %v160_v7 = vld [vmem:[%s2542_s4 + $0x308] sm:$0xff]  ;;  %v1221_v9 = vunpack.c.l.b16 %v267_v56 }
 0x520   :  { %v2298_v26 = vadd.f32 %v997_v12, %v968_v32  ;;  %v1037_v27 = vpop.f32.mrf.mxu0  ;;  %v288_v32 = vpack.c.bf16 %v164_v0, %v164_v0  ;;  %v1222_v12 = vunpack.c.l.b16 %v268_v57  ;;  %v284_v15 = vpack.c.bf16 %v160_v7, %v160_v7  ;;  %v157_v0 = vld [vmem:[%s2542_s4 + $0x2f0] sm:$0xff] }
 0x521   :  { %1388 = vmatpush.bf16.msrb.mxu2 %v1287_v28 }
 0x522   :  { %v1242_v35 = vunpack.c.l.b16 %v288_v32  ;;  %v1275_v28 = vpack.c.b16 %v1222_v12, %v1221_v9  ;;  %v1238_v62 = vunpack.c.l.b16 %v284_v15 }
 0x523   :  { %1611 = vmatmul.msk.bf16.gmra.mxu1 %vm435_vm2, %v1833_v11  ;;  %v269_v11 = vpack.c.bf16 %v145_v18, %v145_v18  ;;  %v1219_v18 = vunpack.c.l.b16 %v265_v59 }
 0x524   :  { %v1285_v8 = vpack.c.b16 %v1242_v35, %v1241_v34  ;;  %v140_v34 = vld [vmem:[%s2542_s4 + $0x268] sm:$0xff] }
 0x525   :  { %1389 = vmatpush.bf16.msrb.mxu2 %v1286_v1  ;;  %v1223_v24 = vunpack.c.l.b16 %v269_v11  ;;  %v158_v1 = vld [vmem:[%s2542_s4 + $0x2f8] sm:$0xff]  ;;  %v281_v11 = vpack.c.bf16 %v157_v0, %v157_v0  ;;  %v1274_v21 = vpack.c.b16 %v1220_v19, %v1219_v18 }
 0x527   :  { %v1000_v20 = vpop.f32.mrf.mxu2 }
 0x528   :  { %v1001_v36 = vadd.f32 %v1000_v20, %v971_v5  ;;  %v1039_v37 = vpop.f32.mrf.mxu0  ;;  %v1276_v5 = vpack.c.b16 %v1224_v44, %v1223_v24  ;;  %v282_v20 = vpack.c.bf16 %v158_v1, %v158_v1  ;;  %v155_v24 = vld [vmem:[%s2542_s4 + $0x2e0] sm:$0xff]  ;;  %v156_v44 = vld [vmem:[%s2542_s4 + $0x2e8] sm:$0xff] }
 0x529   :  { %v1125_v13 = vpack.c.bf16 %v1039_v37, %v1037_v27  ;;  %1390 = vmatpush.bf16.msrb.mxu2 %v1285_v8  ;;  %v1284_v27 = vpack.c.b16 %v1240_v4, %v1239_v58  ;;  %v978_v8 = vpop.f32.mrf.mxu1  ;;  %v279_v49 = vpack.c.bf16 %v155_v24, %v155_v24  ;;  %v280_v50 = vpack.c.bf16 %v156_v44, %v156_v44 }
 0x52a   :  { %v2327_v43 = vadd.f32 %v1001_v36, %v2101_v31  ;;  %1362 = vmatpush.bf16.msra.mxu3 %v1276_v5  ;;  %v283_v31 = vpack.c.bf16 %v159_v6, %v159_v6  ;;  %v264_v36 = vpack.c.bf16 %v140_v34, %v140_v34  ;;  %v1236_v37 = vunpack.c.l.b16 %v282_v20  ;;  %v184_v34 = vld [vmem:[%s2542_s4 + $0x3c8] sm:$0xff] }
 0x52b   :  { %1342 = vmatmul.bf16.gmra.mxu2 %v1125_v13  ;;  %v1217_v13 = vunpack.c.l.b16 %v263_v39  ;;  %v1234_v56 = vunpack.c.l.b16 %v280_v50  ;;  %v307_v20 = vpack.c.bf16 %v183_v33, %v183_v33 }
 0x52c   :  { %v1237_v29 = vunpack.c.l.b16 %v283_v31  ;;  %v1218_v22 = vunpack.c.l.b16 %v264_v36 }
 0x52d   :  { %1391 = vmatpush.bf16.msrb.mxu2 %v1284_v27  ;;  %v1261_v39 = vunpack.c.l.b16 %v307_v20 }
 0x52e   :  { %1363 = vmatpush.bf16.msra.mxu3 %v1275_v28  ;;  %v1283_v35 = vpack.c.b16 %v1238_v62, %v1237_v29  ;;  %v1273_v5 = vpack.c.b16 %v1218_v22, %v1217_v13 }
 0x52f   :  { %v1002_v63 = vpop.f32.mrf.mxu2 }
 0x530   :  { %v2348_v3 = vadd.f32 %v1002_v63, %v2296_v16  ;;  %v1042_v32 = vpop.f32.mrf.mxu0  ;;  %v1235_v16 = vunpack.c.l.b16 %v281_v11  ;;  %v185_v63 = vld [vmem:[%s2542_s4 + $0x3d0] sm:$0xff] }
 0x531   :  { %1392 = vmatpush.bf16.msrb.mxu2 %v1283_v35  ;;  %v981_v12 = vpop.f32.mrf.mxu1  ;;  %v309_v62 = vpack.c.bf16 %v185_v63, %v185_v63  ;;  %v175_v63 = vld [vmem:[%s2542_s4 + $0x380] sm:$0xff] }
 0x532   :  { %1364 = vmatpush.bf16.msra.mxu3 %v1274_v21  ;;  %v1282_v60 = vpack.c.b16 %v1236_v37, %v1235_v16  ;;  %v308_v21 = vpack.c.bf16 %v184_v34, %v184_v34  ;;  %v181_v16 = vld [vmem:[%s2542_s4 + $0x3b0] sm:$0xff]  ;;  %v182_v37 = vld [vmem:[%s2542_s4 + $0x3b8] sm:$0xff] }
 0x533   :  { %1612 = vmatmul.msk.bf16.gmra.mxu1 %vm435_vm2, %v1843_v14  ;;  %v1233_v14 = vunpack.c.l.b16 %v279_v49  ;;  %v1263_v18 = vunpack.c.l.b16 %v309_v62  ;;  %v305_v44 = vpack.c.bf16 %v181_v16, %v181_v16  ;;  %v172_v16 = vld [vmem:[%s2542_s4 + $0x368] sm:$0xff] }
 0x534   :  { %v1262_v36 = vunpack.c.l.b16 %v308_v21 }
 0x535   :  { %1393 = vmatpush.bf16.msrb.mxu2 %v1282_v60  ;;  %v1281_v6 = vpack.c.b16 %v1234_v56, %v1233_v14  ;;  %v1259_v49 = vunpack.c.l.b16 %v305_v44  ;;  %v179_v60 = vld [vmem:[%s2542_s4 + $0x3a0] sm:$0xff]  ;;  %v296_v44 = vpack.c.bf16 %v172_v16, %v172_v16 }
 0x536   :  { %1365 = vmatpush.bf16.msra.mxu3 %v1273_v5  ;;  %v1295_v24 = vpack.c.b16 %v1262_v36, %v1261_v39  ;;  %v180_v5 = vld [vmem:[%s2542_s4 + $0x3a8] sm:$0xff]  ;;  %v303_v56 = vpack.c.bf16 %v179_v60, %v179_v60  ;;  %v171_v36 = vld [vmem:[%s2542_s4 + $0x360] sm:$0xff] }
 0x537   :  { %v1005_v57 = vpop.f32.mrf.mxu2 }
 0x538   :  { %v1006_v58 = vadd.f32 %v1005_v57, %v976_v54  ;;  %v1044_v4 = vpop.f32.mrf.mxu0  ;;  %v304_v57 = vpack.c.bf16 %v180_v5, %v180_v5 }
 0x539   :  { %v1129_v7 = vpack.c.bf16 %v1044_v4, %v1042_v32  ;;  %1394 = vmatpush.bf16.msrb.mxu2 %v1281_v6  ;;  %v2371_v27 = vpop.f32.mrf.mxu1  ;;  %v177_v6 = vld [vmem:[%s2542_s4 + $0x390] sm:$0xff] }
 0x53a   :  { %v2365_v9 = vadd.f32 %v1006_v58, %v2114_v25  ;;  %v1257_v58 = vunpack.c.l.b16 %v303_v56  ;;  %v1258_v4 = vunpack.c.l.b16 %v304_v57 }
 0x53b   :  { %1347 = vmatmul.bf16.gmra.mxu2 %v1129_v7  ;;  %v178_v7 = vld [vmem:[%s2542_s4 + $0x398] sm:$0xff] }
 0x53f   :  { %v1007_v31 = vpop.f32.mrf.mxu2 }
 0x540   :  { %v2367_v15 = vadd.f32 %v1007_v31, %v978_v8  ;;  %v1047_v52 = vpop.f32.mrf.mxu0  ;;  %v306_v8 = vpack.c.bf16 %v182_v37, %v182_v37  ;;  %v301_v31 = vpack.c.bf16 %v177_v6, %v177_v6 }
 0x542   :  { %v1260_v50 = vunpack.c.l.b16 %v306_v8 }
 0x543   :  { %1613 = vmatmul.msk.bf16.gmra.mxu1 %vm435_vm2, %v1853_v17  ;;  %v186_v17 = vld [vmem:[%s2542_s4 + $0x3d8] sm:$0xff] }
 0x544   :  { %v310_v0 = vpack.c.bf16 %v186_v17, %v186_v17  ;;  %v1294_v14 = vpack.c.b16 %v1260_v50, %v1259_v49  ;;  %v176_v17 = vld [vmem:[%s2542_s4 + $0x388] sm:$0xff] }
 0x546   :  { %v1264_v19 = vunpack.c.l.b16 %v310_v0  ;;  %v299_v0 = vpack.c.bf16 %v175_v63, %v175_v63 }
 0x547   :  { %v1010_v55 = vpop.f32.mrf.mxu2 }
 0x548   :  { %v1011_v54 = vadd.f32 %v1010_v55, %v981_v12  ;;  %v1049_v28 = vpop.f32.mrf.mxu0  ;;  %v1296_v35 = vpack.c.b16 %v1264_v19, %v1263_v18  ;;  %v1293_v12 = vpack.c.b16 %v1258_v4, %v1257_v58  ;;  %v173_v19 = vld [vmem:[%s2542_s4 + $0x370] sm:$0xff] }
 0x549   :  { %v1133_v59 = vpack.c.bf16 %v1049_v28, %v1047_v52  ;;  %v302_v52 = vpack.c.bf16 %v178_v7, %v178_v7  ;;  %v1255_v28 = vunpack.c.l.b16 %v301_v31  ;;  %v297_v33 = vpack.c.bf16 %v173_v19, %v173_v19 }
 0x54a   :  { %v2374_v61 = vadd.f32 %v1011_v54, %v2121_v46  ;;  %1416 = vmatpush.bf16.msrb.mxu3 %v1296_v35 }
 0x54b   :  { %1352 = vmatmul.bf16.gmra.mxu2 %v1133_v59  ;;  %v1256_v59 = vunpack.c.l.b16 %v302_v52  ;;  %v1251_v21 = vunpack.c.l.b16 %v297_v33 }
 0x54d   :  { %v1292_v62 = vpack.c.b16 %v1256_v59, %v1255_v28 }
 0x54e   :  { %1417 = vmatpush.bf16.msrb.mxu3 %v1295_v24  ;;  %v295_v24 = vpack.c.bf16 %v171_v36, %v171_v36 }
 0x54f   :  { %v2424_v59 = vpop.f32.mrf.mxu2 }
 0x550   :  { %v1081_v25 = vpop.f32.mrf.mxu1  ;;  %v1052_v29 = vpop.f32.mrf.mxu0  ;;  %v1249_v8 = vunpack.c.l.b16 %v295_v24 }
 0x552   :  { %1418 = vmatpush.bf16.msrb.mxu3 %v1294_v14 }
 0x556   :  { %1419 = vmatpush.bf16.msrb.mxu3 %v1293_v12 }
 0x558   :  { %v1083_v1 = vpop.f32.mrf.mxu1  ;;  %v1054_v32 = vpop.f32.mrf.mxu0 }
 0x559   :  { %v1122_v11 = vpack.c.bf16 %v1083_v1, %v1081_v25  ;;  %v1123_v46 = vpack.c.bf16 %v1054_v32, %v1052_v29  ;;  %v300_v1 = vpack.c.bf16 %v176_v17, %v176_v17  ;;  %v1253_v32 = vunpack.c.l.b16 %v299_v0 }
 0x55a   :  { %1420 = vmatpush.bf16.msrb.mxu3 %v1292_v62 }
 0x55b   :  { %1366 = vmatmul.bf16.vlgmr.msra.gmra.mxu3 %v1122_v11  ;;  %1395 = vmatmul.bf16.vlgmr.msrb.gmra.mxu2 %v1123_v46  ;;  %v1254_v18 = vunpack.c.l.b16 %v300_v1  ;;  %v174_v11 = vld [vmem:[%s2542_s4 + $0x378] sm:$0xff] }
 0x55c   :  { %v298_v34 = vpack.c.bf16 %v174_v11, %v174_v11 }
 0x55d   :  { %v1291_v46 = vpack.c.b16 %v1254_v18, %v1253_v32 }
 0x55e   :  { %v1252_v39 = vunpack.c.l.b16 %v298_v34 }
 0x55f   :  { %1421 = vmatpush.bf16.msrb.mxu3 %v1291_v46 }
 0x560   :  { %v1086_v13 = vpop.f32.mrf.mxu1  ;;  %v1057_v22 = vpop.f32.mrf.mxu0  ;;  %v1290_v37 = vpack.c.b16 %v1252_v39, %v1251_v21 }
 0x563   :  { %1422 = vmatpush.bf16.msrb.mxu3 %v1290_v37 }
 0x568   :  { %v1088_v55 = vpop.f32.mrf.mxu1  ;;  %v1059_v54 = vpop.f32.mrf.mxu0 }
 0x569   :  { %v1126_v25 = vpack.c.bf16 %v1088_v55, %v1086_v13  ;;  %v1127_v29 = vpack.c.bf16 %v1059_v54, %v1057_v22  ;;  %v1250_v13 = vunpack.c.l.b16 %v296_v44 }
 0x56b   :  { %1371 = vmatmul.bf16.gmra.mxu3 %v1126_v25  ;;  %1400 = vmatmul.bf16.gmra.mxu2 %v1127_v29  ;;  %v1289_v22 = vpack.c.b16 %v1250_v13, %v1249_v8 }
 0x56d   :  { %1423 = vmatpush.bf16.msrb.mxu3 %v1289_v22 }
 0x570   :  { %v1091_v35 = vpop.f32.mrf.mxu1  ;;  %v1062_v20 = vpop.f32.mrf.mxu0 }
 0x578   :  { %v1093_v49 = vpop.f32.mrf.mxu1  ;;  %v1064_v50 = vpop.f32.mrf.mxu0 }
 0x579   :  { %v1130_v60 = vpack.c.bf16 %v1093_v49, %v1091_v35  ;;  %v1131_v5 = vpack.c.bf16 %v1064_v50, %v1062_v20 }
 0x57b   :  { %1376 = vmatmul.bf16.gmra.mxu3 %v1130_v60  ;;  %1405 = vmatmul.bf16.gmra.mxu2 %v1131_v5  ;;  %v1690_v60 = vld [vmem:[%s2543_s5] ss:$0 sm:$0xff] }
 0x57c   :  { %v428_v5 = vadd.f32 %v1690_v60, %v1923_v23 }
 0x580   :  { %v1096_v14 = vpop.f32.mrf.mxu1  ;;  %v1067_v56 = vpop.f32.mrf.mxu0 }
 0x588   :  { %v1098_v57 = vpop.f32.mrf.mxu1  ;;  %v1069_v58 = vpop.f32.mrf.mxu0 }
 0x589   :  { %v1134_v4 = vpack.c.bf16 %v1098_v57, %v1096_v14  ;;  %v1135_v6 = vpack.c.bf16 %v1069_v58, %v1067_v56  ;;  %v619_v57 = vadd.f32 %v1930_v41, %v428_v5 }
 0x58b   :  { %1381 = vmatmul.bf16.gmra.mxu3 %v1134_v4  ;;  %1410 = vmatmul.bf16.gmra.mxu2 %v1135_v6  ;;  %v797_v4 = vadd.f32 %v2084_v10, %v619_v57 }
 0x590   :  { %v1101_v7 = vpop.f32.mrf.mxu1 }
 0x598   :  { %v1103_v12 = vpop.f32.mrf.mxu1 }
 0x599   :  { %v1124_v31 = vpack.c.bf16 %v1103_v12, %v1101_v7  ;;  %v1016_v12 = vadd.f32 %v2298_v26, %v797_v4 }
 0x59b   :  { %1424 = vmatmul.bf16.vlgmr.msrb.gmra.mxu3 %v1124_v31 }
 0x59e   :  { %v1338_v63 = vpop.f32.mrf.mxu2 }
 0x5a0   :  { %v1106_v52 = vpop.f32.mrf.mxu1 }
 0x5a6   :  { %v1340_v62 = vpop.f32.mrf.mxu2 }
 0x5a8   :  { %v1108_v55 = vpop.f32.mrf.mxu1 }
 0x5a9   :  { %v1128_v54 = vpack.c.bf16 %v1108_v55, %v1106_v52 }
 0x5ab   :  { %1429 = vmatmul.bf16.gmra.mxu3 %v1128_v54 }
 0x5ae   :  { %v1343_v32 = vpop.f32.mrf.mxu2 }
 0x5b0   :  { %v1111_v28 = vpop.f32.mrf.mxu1 }
 0x5b6   :  { %v1345_v18 = vpop.f32.mrf.mxu2 }
 0x5b8   :  { %v1113_v25 = vpop.f32.mrf.mxu1 }
 0x5b9   :  { %v1132_v29 = vpack.c.bf16 %v1113_v25, %v1111_v28  ;;  %v430_v25 = vadd.f32 %v1690_v60, %v1934_v42 }
 0x5bb   :  { %1434 = vmatmul.bf16.gmra.mxu3 %v1132_v29  ;;  %v621_v26 = vadd.f32 %v1938_v47, %v430_v25 }
 0x5be   :  { %v1348_v11 = vpop.f32.mrf.mxu2 }
 0x5c0   :  { %v1116_v17 = vpop.f32.mrf.mxu1 }
 0x5c6   :  { %v1350_v33 = vpop.f32.mrf.mxu2 }
 0x5c8   :  { %v1118_v0 = vpop.f32.mrf.mxu1 }
 0x5c9   :  { %v1136_v1 = vpack.c.bf16 %v1118_v0, %v1116_v17 }
 0x5cb   :  { %1439 = vmatmul.bf16.gmra.mxu3 %v1136_v1 }
 0x5ce   :  { %v2426_v20 = vpop.f32.mrf.mxu2 }
 0x5d6   :  { %v2428_v39 = vpop.f32.mrf.mxu2 }
 0x5de   :  { %v1367_v19 = vpop.f32.mrf.mxu3  ;;  %v1396_v16 = vpop.f32.mrf.mxu2 }
 0x5df   :  { %v1368_v8 = vadd.f32 %v1367_v19, %v1338_v63 }
 0x5e1   :  { %v1397_v13 = vadd.f32 %v1396_v16, %v1368_v8  ;;  %v432_v16 = vadd.f32 %v1690_v60, %v1944_v51 }
 0x5e6   :  { %v1369_v46 = vpop.f32.mrf.mxu3  ;;  %v1398_v24 = vpop.f32.mrf.mxu2 }
 0x5e7   :  { %v1370_v14 = vadd.f32 %v1369_v46, %v1340_v62  ;;  %v799_v62 = vadd.f32 %v2109_v45, %v621_v26  ;;  %v623_v45 = vadd.f32 %v1948_v53, %v432_v16 }
 0x5e9   :  { %v1399_v6 = vadd.f32 %v1398_v24, %v1370_v14 }
 0x5ee   :  { %v1372_v34 = vpop.f32.mrf.mxu3  ;;  %v1401_v50 = vpop.f32.mrf.mxu2 }
 0x5ef   :  { %v1373_v52 = vadd.f32 %v1372_v34, %v1343_v32  ;;  %v1018_v32 = vadd.f32 %v2348_v3, %v799_v62  ;;  %v801_v3 = vadd.f32 %v2116_v38, %v623_v45 }
 0x5f1   :  { %v1402_v41 = vadd.f32 %v1401_v50, %v1373_v52 }
 0x5f6   :  { %v1374_v35 = vpop.f32.mrf.mxu3  ;;  %v1403_v23 = vpop.f32.mrf.mxu2 }
 0x5f7   :  { %v1375_v29 = vadd.f32 %v1374_v35, %v1345_v18 }
 0x5f9   :  { %v1404_v0 = vadd.f32 %v1403_v23, %v1375_v29 }
 0x5fe   :  { %v1377_v21 = vpop.f32.mrf.mxu3  ;;  %v1406_v17 = vpop.f32.mrf.mxu2 }
 0x5ff   :  { %v1378_v46 = vadd.f32 %v1377_v21, %v1348_v11 }
 0x606   :  { %v1379_v36 = vpop.f32.mrf.mxu3  ;;  %v1408_v34 = vpop.f32.mrf.mxu2 }
 0x607   :  { %v1380_v24 = vadd.f32 %v1379_v36, %v1350_v33  ;;  %v434_v36 = vadd.f32 %v1690_v60, %v2053_v30 }
 0x609   :  { %v1409_v11 = vadd.f32 %v1408_v34, %v1380_v24 }
 0x60e   :  { %v1382_v37 = vpop.f32.mrf.mxu3  ;;  %v1411_v50 = vpop.f32.mrf.mxu2 }
 0x60f   :  { %v1383_v5 = vadd.f32 %v1382_v37, %v2426_v20  ;;  %v1013_v20 = vadd.f32 %v2424_v59, %v2371_v27 }
 0x616   :  { %v2430_v44 = vpop.f32.mrf.mxu3 }
 0x617   :  { %v1385_v38 = vadd.f32 %v2430_v44, %v2428_v39 }
 0x61e   :  { %v1425_v22 = vpop.f32.mrf.mxu3 }
 0x61f   :  { %v1426_v49 = vadd.f32 %v1425_v22, %v1397_v13  ;;  %v1020_v22 = vadd.f32 %v2367_v15, %v801_v3  ;;  %v625_v15 = vadd.f32 %v2118_v40, %v434_v36 }
 0x621   :  { %v2437_v56 = vadd.f32 %v1426_v49, %v2276_v48  ;;  %v803_v4 = vadd.f32 %v2249_v2, %v625_v15 }
 0x623   :  { %v1454_v58 = vsel %vm1453_vm3, %v2437_v56, -inf }
 0x624   :  { %1455 = vmax.xlane.f32.xlu2 %v1454_v58  ;;  %v1413_v58 = vpop.f32.mrf.mxu2 }
 0x626   :  { %v1427_v7 = vpop.f32.mrf.mxu3 }
 0x627   :  { %v1428_v31 = vadd.f32 %v1427_v7, %v1399_v6  ;;  %v1414_v6 = vadd.f32 %v1413_v58, %v1385_v38 }
 0x629   :  { %v2444_v55 = vadd.f32 %v1428_v31, %v1016_v12  ;;  %v1022_v12 = vadd.f32 %v1013_v20, %v803_v4 }
 0x62b   :  { %v1457_v48 = vsel %vm1453_vm3, %v2444_v55, -inf }
 0x62c   :  { %1458 = vmax.xlane.f32.xlu0 %v1457_v48 }
 0x62e   :  { %v1430_v54 = vpop.f32.mrf.mxu3 }
 0x62f   :  { %v1431_v28 = vadd.f32 %v1430_v54, %v1402_v41 }
 0x631   :  { %v2450_v10 = vadd.f32 %v1431_v28, %v2327_v43  ;;  %v1407_v43 = vadd.f32 %v1406_v17, %v1378_v46 }
 0x633   :  { %v1460_v63 = vsel %vm1453_vm3, %v2450_v10, -inf }
 0x634   :  { %1461 = vmax.xlane.f32.xlu1 %v1460_v63 }
 0x636   :  { %v1432_v1 = vpop.f32.mrf.mxu3 }
 0x637   :  { %v1433_v19 = vadd.f32 %v1432_v1, %v1404_v0 }
 0x639   :  { %v1448_v42 = vadd.f32 %v1433_v19, %v1018_v32 }
 0x63b   :  { %v1463_v18 = vsel %vm1453_vm3, %v1448_v42, -inf }
 0x63c   :  { %1464 = vmax.xlane.f32.xlu2 %v1463_v18 }
 0x63e   :  { %v1435_v47 = vpop.f32.mrf.mxu3 }
 0x63f   :  { %v1436_v35 = vadd.f32 %v1435_v47, %v1407_v43 }
 0x641   :  { %v1449_v8 = vadd.f32 %v1436_v35, %v2365_v9  ;;  %v1412_v9 = vadd.f32 %v1411_v50, %v1383_v5 }
 0x643   :  { %v1466_v13 = vsel %vm1453_vm3, %v1449_v8, -inf }
 0x644   :  { %1467 = vmax.xlane.f32.xlu2 %v1466_v13 }
 0x646   :  { %v1437_v21 = vpop.f32.mrf.mxu3 }
 0x647   :  { %v1438_v49 = vadd.f32 %v1437_v21, %v1409_v11 }
 0x649   :  { %v1450_v14 = vadd.f32 %v1438_v49, %v1020_v22 }
 0x64b   :  { %v1469_v51 = vsel %vm1453_vm3, %v1450_v14, -inf }
 0x64c   :  { %1470 = vmax.xlane.f32.xlu0 %v1469_v51 }
 0x64e   :  { %v1440_v33 = vpop.f32.mrf.mxu3 }
 0x64f   :  { %v1441_v53 = vadd.f32 %v1440_v33, %v1412_v9 }
 0x651   :  { %v1451_v57 = vadd.f32 %v1441_v53, %v2374_v61 }
 0x653   :  { %v1472_v37 = vsel %vm1453_vm3, %v1451_v57, -inf }
 0x654   :  { %1473 = vmax.xlane.f32.xlu1 %v1472_v37 }
 0x656   :  { %v1442_v7 = vpop.f32.mrf.mxu3 }
 0x657   :  { %v1443_v30 = vadd.f32 %v1442_v7, %v1414_v6 }
 0x659   :  { %v1452_v60 = vadd.f32 %v1443_v30, %v1022_v12 }
 0x65b   :  { %v1475_v39 = vsel %vm1453_vm3, %v1452_v60, -inf }
 0x65c   :  { %1476 = vmax.xlane.f32.xlu2 %v1475_v39 }
 0x697   :  { %v1456_v61 = vpop.xlane.xlu2 %1455 }
 0x698   :  { %v2477_v44 = vsub.f32 %v2437_v56, %v1456_v61 }
 0x69a   :  { %v1486_v40 = vmul.f32 1.442695, %v2477_v44 }
 0x69c   :  { %1658 = vpow2.f32 %v1486_v40 }
 0x69f   :  { %v1459_v27 = vpop.xlane.xlu0 %1458 }
 0x6a0   :  { %v2481_v59 = vsub.f32 %v2444_v55, %v1459_v27 }
 0x6a2   :  { %v1659_v2 = vpop.eup %1658  ;;  %v1488_v31 = vmul.f32 1.442695, %v2481_v59 }
 0x6a3   :  { %v1502_v52 = vsel %vm1453_vm3, %v1659_v2, 0.0 }
 0x6a4   :  { %1660 = vpow2.f32 %v1488_v31  ;;  %1503 = vadd.xlane.f32.xlu0 %v1502_v52 }
 0x6a7   :  { %v1462_v23 = vpop.xlane.xlu1 %1461 }
 0x6a8   :  { %v2486_v48 = vsub.f32 %v2450_v10, %v1462_v23 }
 0x6aa   :  { %v1661_v56 = vpop.eup %1660  ;;  %v1490_v41 = vmul.f32 1.442695, %v2486_v48 }
 0x6ab   :  { %v1505_v54 = vsel %vm1453_vm3, %v1661_v56, 0.0 }
 0x6ac   :  { %1662 = vpow2.f32 %v1490_v41  ;;  %1506 = vadd.xlane.f32.xlu1 %v1505_v54 }
 0x6af   :  { %v1465_v55 = vpop.xlane.xlu2 %1464 }
 0x6b0   :  { %v2490_v28 = vsub.f32 %v1448_v42, %v1465_v55 }
 0x6b2   :  { %v1663_v25 = vpop.eup %1662  ;;  %v1492_v29 = vmul.f32 1.442695, %v2490_v28 }
 0x6b3   :  { %v1508_v26 = vsel %vm1453_vm3, %v1663_v25, 0.0 }
 0x6b4   :  { %1664 = vpow2.f32 %v1492_v29  ;;  %1509 = vadd.xlane.f32.xlu2 %v1508_v26 }
 0x6b7   :  { %v1468_v63 = vpop.xlane.xlu2 %1467 }
 0x6b8   :  { %v2494_v10 = vsub.f32 %v1449_v8, %v1468_v63 }
 0x6ba   :  { %v1665_v17 = vpop.eup %1664  ;;  %v1494_v62 = vmul.f32 1.442695, %v2494_v10 }
 0x6bb   :  { %v1511_v0 = vsel %vm1453_vm3, %v1665_v17, 0.0 }
 0x6bc   :  { %1666 = vpow2.f32 %v1494_v62  ;;  %1512 = vadd.xlane.f32.xlu0 %v1511_v0 }
 0x6bf   :  { %v1471_v1 = vpop.xlane.xlu0 %1470 }
 0x6c0   :  { %v1483_v32 = vsub.f32 %v1450_v14, %v1471_v1 }
 0x6c2   :  { %v1667_v19 = vpop.eup %1666  ;;  %v1496_v46 = vmul.f32 1.442695, %v1483_v32 }
 0x6c3   :  { %v1514_v42 = vsel %vm1453_vm3, %v1667_v19, 0.0 }
 0x6c4   :  { %1668 = vpow2.f32 %v1496_v46  ;;  %1515 = vadd.xlane.f32.xlu1 %v1514_v42 }
 0x6c7   :  { %v1474_v18 = vpop.xlane.xlu1 %1473 }
 0x6c8   :  { %v1484_v43 = vsub.f32 %v1451_v57, %v1474_v18 }
 0x6ca   :  { %v1669_v34 = vpop.eup %1668  ;;  %v1498_v47 = vmul.f32 1.442695, %v1484_v43 }
 0x6cb   :  { %v1517_v35 = vsel %vm1453_vm3, %v1669_v34, 0.0 }
 0x6cc   :  { %1670 = vpow2.f32 %v1498_v47  ;;  %1518 = vadd.xlane.f32.xlu2 %v1517_v35 }
 0x6cf   :  { %v1477_v16 = vpop.xlane.xlu2 %1476 }
 0x6d0   :  { %v1485_v24 = vsub.f32 %v1452_v60, %v1477_v16 }
 0x6d2   :  { %v1671_v8 = vpop.eup %1670  ;;  %v1500_v45 = vmul.f32 1.442695, %v1485_v24 }
 0x6d3   :  { %v1520_v13 = vsel %vm1453_vm3, %v1671_v8, 0.0 }
 0x6d4   :  { %1672 = vpow2.f32 %v1500_v45  ;;  %1521 = vadd.xlane.f32.xlu0 %v1520_v13 }
 0x6da   :  { %v1673_v3 = vpop.eup %1672 }
 0x6db   :  { %v1523_v11 = vsel %vm1453_vm3, %v1673_v3, 0.0 }
 0x6dc   :  { %1524 = vadd.xlane.f32.xlu1 %v1523_v11 }
 0x717   :  { %v1504_v21 = vpop.xlane.xlu0 %1503 }
 0x718   :  { %1674 = vlog2.f32 %v1504_v21 }
 0x71e   :  { %v1675_v22 = vpop.eup %1674 }
 0x71f   :  { %v1527_v49 = vmul.f32 0.6931472, %v1675_v22  ;;  %v1507_v50 = vpop.xlane.xlu1 %1506 }
 0x720   :  { %1676 = vlog2.f32 %v1507_v50 }
 0x721   :  { %v1542_v5 = vsub.f32 %v2477_v44, %v1527_v49 }
 0x723   :  { %1550 = vst.msk [vmem:[%s2545_s6] sm:$0xff] %vm1453_vm3, %v1542_v5 }
 0x726   :  { %v1677_v14 = vpop.eup %1676 }
 0x727   :  { %v1529_v51 = vmul.f32 0.6931472, %v1677_v14  ;;  %v1510_v9 = vpop.xlane.xlu2 %1509 }
 0x728   :  { %1678 = vlog2.f32 %v1510_v9 }
 0x729   :  { %v1543_v33 = vsub.f32 %v2481_v59, %v1529_v51 }
 0x72b   :  { %1551 = vst.msk [vmem:[%s2545_s6 + $0x8] sm:$0xff] %vm1453_vm3, %v1543_v33 }
 0x72e   :  { %v1679_v53 = vpop.eup %1678 }
 0x72f   :  { %v1531_v36 = vmul.f32 0.6931472, %v1679_v53  ;;  %v1513_v38 = vpop.xlane.xlu0 %1512 }
 0x730   :  { %1680 = vlog2.f32 %v1513_v38 }
 0x731   :  { %v1544_v57 = vsub.f32 %v2486_v48, %v1531_v36 }
 0x733   :  { %1552 = vst.msk [vmem:[%s2545_s6 + $0x10] sm:$0xff] %vm1453_vm3, %v1544_v57 }
 0x736   :  { %v1681_v58 = vpop.eup %1680 }
 0x737   :  { %v1533_v15 = vmul.f32 0.6931472, %v1681_v58  ;;  %v1516_v20 = vpop.xlane.xlu1 %1515 }
 0x738   :  { %1682 = vlog2.f32 %v1516_v20 }
 0x739   :  { %v1545_v37 = vsub.f32 %v2490_v28, %v1533_v15 }
 0x73b   :  { %1553 = vst.msk [vmem:[%s2545_s6 + $0x18] sm:$0xff] %vm1453_vm3, %v1545_v37 }
 0x73e   :  { %v1683_v4 = vpop.eup %1682 }
 0x73f   :  { %v1535_v6 = vmul.f32 0.6931472, %v1683_v4  ;;  %v1519_v7 = vpop.xlane.xlu2 %1518 }
 0x740   :  { %1684 = vlog2.f32 %v1519_v7 }
 0x741   :  { %v1546_v12 = vsub.f32 %v2494_v10, %v1535_v6 }
 0x743   :  { %1554 = vst.msk [vmem:[%s2545_s6 + $0x20] sm:$0xff] %vm1453_vm3, %v1546_v12 }
 0x746   :  { %v1685_v30 = vpop.eup %1684 }
 0x747   :  { %v1537_v60 = vmul.f32 0.6931472, %v1685_v30  ;;  %v1522_v39 = vpop.xlane.xlu0 %1521 }
 0x748   :  { %1686 = vlog2.f32 %v1522_v39 }
 0x749   :  { %v1547_v61 = vsub.f32 %v1483_v32, %v1537_v60 }
 0x74b   :  { %1555 = vst.msk [vmem:[%s2545_s6 + $0x28] sm:$0xff] %vm1453_vm3, %v1547_v61 }
 0x74e   :  { %v1687_v44 = vpop.eup %1686 }
 0x74f   :  { %v1539_v40 = vmul.f32 0.6931472, %v1687_v44  ;;  %v1525_v27 = vpop.xlane.xlu1 %1524 }
 0x750   :  { %1688 = vlog2.f32 %v1525_v27 }
 0x751   :  { %v1548_v59 = vsub.f32 %v1484_v43, %v1539_v40 }
 0x753   :  { %1556 = vst.msk [vmem:[%s2545_s6 + $0x30] sm:$0xff] %vm1453_vm3, %v1548_v59 }
 0x756   :  { %v1689_v2 = vpop.eup %1688 }
 0x757   :  { %v1541_v31 = vmul.f32 0.6931472, %v1689_v2 }
 0x759   :  { %v1549_v52 = vsub.f32 %v1485_v24, %v1541_v31 }
 0x75b   :  { %1557 = vst.msk [vmem:[%s2545_s6 + $0x38] sm:$0xff] %vm1453_vm3, %v1549_v52 }

</bundles_post_ra>
